<compile_context>
chip_gen: v6e
topology: v6e:2x2x1
jax: 0.10.0
libtpu: 0.0.40
codegen_flags: <defaults>
</compile_context>

<pallas_src>
import math

import jax
import jax.numpy as jnp
from jax import lax
from jax.experimental import pallas as pl
from jax.experimental.pallas import tpu as pltpu


def _make_attention_kernel(batch_tile, seq_len, emb_dim, k_dim, num_head):
    Bt, N, D, K, H = batch_tile, seq_len, emb_dim, k_dim, num_head
    Hd = D // H

    def kernel(x_ref, wq_ref, wk_ref, pkT_ref, o_ref):
        # ---- fused projections over all Bt*N rows (one big MXU M dimension) ----
        x2 = jnp.reshape(x_ref[...], (Bt * N, D))          # bf16
        wq = wq_ref[...]                                    # (D, D) bf16, 1/sqrt(Hd) folded in
        wk = wk_ref[...]                                    # (D, D) bf16
        pkT = pkT_ref[...]                                  # (K, N) bf16 (host-transposed)

        # Two zero-offset matmuls (D need not be 128-aligned, so no fused-weight lane slice).
        q2 = jnp.dot(x2, wq, preferred_element_type=jnp.float32)    # (Bt*N, D) f32, pre-scaled
        kf2 = jnp.dot(x2, wk, preferred_element_type=jnp.float32)   # (Bt*N, D) f32
        kf2b = kf2.astype(jnp.bfloat16)

        # ---- per-batch attention (Bt is small and static; bounds live f32 intermediates) ----
        for b in range(Bt):
            rows = slice(b * N, (b + 1) * N)
            q = q2[rows]                                    # (N, D) f32
            kfb = kf2b[rows]                                # (N, D) bf16

            # kp[k, d] = sum_n project_k[n, k] * kf[n, d]  -- clean (K,N)@(N,D) MXU matmul.
            kp = jnp.dot(pkT, kfb, preferred_element_type=jnp.float32)      # (K, D) f32

            # torch quirk: keys = einsum(...,'bkd').permute(0,2,1).view(B, K, H, Hd)
            # == row-major reinterpretation of kp.T ; the transpose rides the XLU.
            keys = jnp.transpose(jnp.reshape(jnp.transpose(kp), (K, H, Hd)), (1, 0, 2))
            vals = jnp.transpose(jnp.reshape(kp, (K, H, Hd)), (1, 0, 2))     # (H, K, Hd)
            qh = jnp.transpose(jnp.reshape(q, (N, H, Hd)), (1, 0, 2))        # (H, N, Hd)

            # Head-batched attention: one MXU stream instead of H tiny matmuls.
            dots = jnp.einsum('hnd,hkd->hnk',
                              qh.astype(jnp.bfloat16), keys.astype(jnp.bfloat16),
                              preferred_element_type=jnp.float32)            # (H, N, K) f32

            # f32 softmax stats; normalization deferred to after PV (K > Hd typically).
            m = jnp.max(dots, axis=-1, keepdims=True)
            e = jnp.exp(dots - m)                                            # e <= 1
            s = jnp.sum(e, axis=-1, keepdims=True)                           # (H, N, 1)
            # TODO(synk): nn.Dropout(p) omitted -- eval-mode identity (no RNG dropout).

            outh = jnp.einsum('hnk,hkd->hnd',
                              e.astype(jnp.bfloat16), vals.astype(jnp.bfloat16),
                              preferred_element_type=jnp.float32)            # (H, N, Hd) f32
            outh = outh * pl.reciprocal(s, approx=True)                      # EUP divide

            # Lane-dense full-width (N, D) store for this batch row.
            out = jnp.reshape(jnp.transpose(outh, (1, 0, 2)), (N, D))
            o_ref[b] = out.astype(o_ref.dtype)

    return kernel


def _block_diag_from_grouped(w_conv, groups):
    """w_conv: (out_ch=D, in_ch_per_group=cg, kernel=1) -> dense (D, D) block-diagonal matrix."""
    D = w_conv.shape[0]
    cg = D // groups
    blocks = [w_conv[g * cg:(g + 1) * cg, :, 0] for g in range(groups)]
    return jax.scipy.linalg.block_diag(*blocks)


def _pick_batch_tile(B, N, D, K, H, out_itemsize, vmem_budget_bytes):
    """Largest batch tile (divisor of B, <=16) whose per-step VMEM estimate fits the budget,
    keeping >=2 grid steps when B >= 2 so both v7x TensorCores get work."""
    best = 1
    for bt in range(1, min(B, 16) + 1):
        if B % bt:
            continue
        if B >= 2 and (B // bt) < 2:
            continue
        resident = 2 * (2 * D * D * 2 + K * N * 2)                    # Wq/Wk + pk^T (worst-case x2)
        io = 2 * bt * N * D * 2 + 2 * bt * N * D * out_itemsize       # x + out tiles, double-buffered
        interm = (2 * bt * N * D * 4 + bt * N * D * 2                 # q2/kf2 f32 + kf bf16
                  + 2 * K * D * 4                                     # kp + its transpose
                  + 2 * H * N * K * 4                                 # dots + e (per-batch loop)
                  + N * D * 4)                                        # outh / out
        if resident + io + interm <= vmem_budget_bytes:
            best = bt
    return best


def bonz_self_attention(x, wq_conv, wk_conv, project_k, *, num_head, group_att):
    B, N, D = x.shape
    K = project_k.shape[1]
    H = num_head
    Hd = D // H
    scale = 1.0 / math.sqrt(Hd)

    # NOTE: in a full model these weight preps (block-diag, scale fold, transpose, bf16 cast)
    # would be cached once per parameter set rather than recomputed per call.
    WqT = (_block_diag_from_grouped(wq_conv, group_att).T * scale).astype(jnp.bfloat16)   # (D, D)
    WkT = _block_diag_from_grouped(wk_conv, group_att).T.astype(jnp.bfloat16)             # (D, D)
    pkT = project_k.T.astype(jnp.bfloat16)                                                # (K, N)
    x_b = x.astype(jnp.bfloat16)

    out_itemsize = jnp.dtype(x.dtype).itemsize
    Bt = _pick_batch_tile(B, N, D, K, H, out_itemsize, vmem_budget_bytes=24 * 1024 * 1024)
    grid = (B // Bt,)

    cost = pl.CostEstimate(
        flops=4 * B * N * D * D + 2 * B * K * N * D + 4 * B * H * N * K * Hd,
        transcendentals=B * H * N * K,
        bytes_accessed=(B * N * D * 2 + B * N * D * out_itemsize
                        + 2 * D * D * 2 + K * N * 2),
    )

    kernel = _make_attention_kernel(Bt, N, D, K, H)
    return pl.pallas_call(
        kernel,
        out_shape=jax.ShapeDtypeStruct((B, N, D), x.dtype),
        grid=grid,
        in_specs=[
            pl.BlockSpec((Bt, N, D), lambda b: (b, 0, 0)),   # batch-blocked activation tile
            pl.BlockSpec((D, D), lambda b: (0, 0)),          # scaled Wq^T (resident)
            pl.BlockSpec((D, D), lambda b: (0, 0)),          # Wk^T (resident)
            pl.BlockSpec((K, N), lambda b: (0, 0)),          # project_k^T (resident)
        ],
        out_specs=pl.BlockSpec((Bt, N, D), lambda b: (b, 0, 0)),
        compiler_params=pltpu.CompilerParams(
            dimension_semantics=("parallel",),
            vmem_limit_bytes=32 * 1024 * 1024,
        ),
        cost_estimate=cost,
    )(x_b, WqT, WkT, pkT)


def _reference(x, wq_conv, wk_conv, pk, *, num_head, group_att):
    """Pure-JAX mirror of the PyTorch forward (incl. its key/value quirks).

    Inputs/weights are rounded to bf16 exactly as the kernel wrapper does, but all math is f32,
    so the only kernel/reference deltas are intermediate bf16 casts, the approximate reciprocal
    and accumulation order.
    """
    B, N, D = x.shape
    K = pk.shape[1]
    H, Hd = num_head, D // num_head
    scale = 1.0 / math.sqrt(Hd)
    r = lambda a: a.astype(jnp.bfloat16).astype(jnp.float32)

    Wq = r(_block_diag_from_grouped(wq_conv, group_att).T * scale)   # (D_in, D_out), pre-scaled
    Wk = r(_block_diag_from_grouped(wk_conv, group_att).T)
    xr, pkr = r(x), r(pk)

    q = jnp.einsum('bnd,do->bno', xr, Wq)
    kf = jnp.einsum('bnd,do->bno', xr, Wk)                 # key conv (also used for values)
    kp = jnp.einsum('bnd,nk->bkd', kf, pkr)                # (B, K, D)
    keys = jnp.transpose(kp, (0, 2, 1)).reshape(B, K, H, Hd).transpose(0, 2, 1, 3)
    vals = kp.reshape(B, K, H, Hd).transpose(0, 2, 1, 3)
    qh = q.reshape(B, N, H, Hd).transpose(0, 2, 1, 3)
    dots = jnp.einsum('bhnd,bhkd->bhnk', qh, keys)         # scale already folded into Wq
    attn = jax.nn.softmax(dots, axis=-1)
    out = jnp.einsum('bhnk,bhkd->bhnd', attn, vals)
    return out.transpose(0, 2, 1, 3).reshape(B, N, D)


if __name__ == "__main__":
    # Small, consistent config: batch=4, seq_len=16, emb_dim=32, k_dim=8,
    # num_head=4 (head_dim=8), group_att=4, kernel_att=1 (default).
    # B=4 exercises both batch-blocking (Bt=2) and a >=2-step parallel grid.
    B, N, D, K, H, G = 4, 16, 32, 8, 4, 4
    cg = D // G

    key = jax.random.PRNGKey(0)
    kx, kq, kk, kpk = jax.random.split(key, 4)
    x = jax.random.normal(kx, (B, N, D), jnp.float32)

    bound = 1.0 / math.sqrt(cg)  # conv fan_in = (in_ch/groups) * kernel_size = cg * 1
    wq_conv = jax.random.uniform(kq, (D, cg, 1), jnp.float32, -bound, bound)
    wk_conv = jax.random.uniform(kk, (D, cg, 1), jnp.float32, -bound, bound)

    std = 1.0 / math.sqrt(K)     # init_(): uniform(-1/sqrt(k_dim), 1/sqrt(k_dim))
    project_k = jax.random.uniform(kpk, (N, K), jnp.float32, -std, std)

    out = bonz_self_attention(x, wq_conv, wk_conv, project_k, num_head=H, group_att=G)
    out = jax.block_until_ready(out)

    ref = _reference(x, wq_conv, wk_conv, project_k, num_head=H, group_att=G)
    assert out.shape == (B, N, D)
    max_err = float(jnp.max(jnp.abs(out - ref)))
    # bf16 matmul operands + approx reciprocal -> bf16-appropriate tolerance.
    assert jnp.allclose(out, ref, atol=3e-2, rtol=3e-2), max_err

    print("KERNEL_OK")
</pallas_src>

<mosaic_0001>
module attributes {stable_mosaic.version = 11 : i64} {
  func.func @kernel(%arg0: i32, %arg1: memref<2x16x32xbf16, #tpu.memory_space<vmem>>, %arg2: memref<32x32xbf16, #tpu.memory_space<vmem>>, %arg3: memref<32x32xbf16, #tpu.memory_space<vmem>>, %arg4: memref<8x16xbf16, #tpu.memory_space<vmem>>, %arg5: memref<2x16x32xf32, #tpu.memory_space<vmem>>) attributes {dimension_semantics = [#tpu.dimension_semantics<parallel>], iteration_bounds = array<i64: 2>, scalar_prefetch = 0 : i64, scratch_operands = 0 : i64, tpu.core_type = #tpu.core_type<tc>, window_params = [{transform_indices = @transform_0, window_bounds = array<i64: 2, 16, 32>}, {pipeline_mode = #tpu.pipeline_mode<synchronous>, transform_indices = @transform_1, window_bounds = array<i64: 32, 32>}, {pipeline_mode = #tpu.pipeline_mode<synchronous>, transform_indices = @transform_2, window_bounds = array<i64: 32, 32>}, {pipeline_mode = #tpu.pipeline_mode<synchronous>, transform_indices = @transform_3, window_bounds = array<i64: 8, 16>}, {transform_indices = @transform_4, window_bounds = array<i64: 2, 16, 32>}]} {
    %c0 = arith.constant 0 : index
    %c0_0 = arith.constant 0 : index
    %c0_1 = arith.constant 0 : index
    %0 = vector.load %arg1[%c0, %c0_0, %c0_1] : memref<2x16x32xbf16, #tpu.memory_space<vmem>>, vector<2x16x32xbf16>
    %1 = vector.shape_cast %0 : vector<2x16x32xbf16> to vector<32x32xbf16>
    %c0_2 = arith.constant 0 : index
    %c0_3 = arith.constant 0 : index
    %2 = vector.load %arg2[%c0_2, %c0_3] : memref<32x32xbf16, #tpu.memory_space<vmem>>, vector<32x32xbf16>
    %c0_4 = arith.constant 0 : index
    %c0_5 = arith.constant 0 : index
    %3 = vector.load %arg3[%c0_4, %c0_5] : memref<32x32xbf16, #tpu.memory_space<vmem>>, vector<32x32xbf16>
    %c0_6 = arith.constant 0 : index
    %c0_7 = arith.constant 0 : index
    %4 = vector.load %arg4[%c0_6, %c0_7] : memref<8x16xbf16, #tpu.memory_space<vmem>>, vector<8x16xbf16>
    %cst = arith.constant dense<0.000000e+00> : vector<32x32xf32>
    %5 = tpu.matmul %1, %2, %cst {dimension_numbers = #tpu.dot_dimension_numbers<[1], [0], [0], [1], [0, 0, 1, 1], [], []>} : vector<32x32xbf16>, vector<32x32xbf16>, vector<32x32xf32> -> vector<32x32xf32>
    %cst_8 = arith.constant dense<0.000000e+00> : vector<32x32xf32>
    %6 = tpu.matmul %1, %3, %cst_8 {dimension_numbers = #tpu.dot_dimension_numbers<[1], [0], [0], [1], [0, 0, 1, 1], [], []>} : vector<32x32xbf16>, vector<32x32xbf16>, vector<32x32xf32> -> vector<32x32xf32>
    %7 = arith.truncf %6 : vector<32x32xf32> to vector<32x32xbf16>
    %8 = vector.extract_strided_slice %5 {offsets = [0, 0], sizes = [16, 32], strides = [1, 1]} : vector<32x32xf32> to vector<16x32xf32>
    %9 = vector.extract_strided_slice %7 {offsets = [0, 0], sizes = [16, 32], strides = [1, 1]} : vector<32x32xbf16> to vector<16x32xbf16>
    %cst_9 = arith.constant dense<0.000000e+00> : vector<8x32xf32>
    %10 = tpu.matmul %4, %9, %cst_9 {dimension_numbers = #tpu.dot_dimension_numbers<[1], [0], [0], [1], [0, 0, 1, 1], [], []>} : vector<8x16xbf16>, vector<16x32xbf16>, vector<8x32xf32> -> vector<8x32xf32>
    %11 = tpu.transpose %10, [1, 0] : vector<8x32xf32> -> vector<32x8xf32>
    %12 = vector.shape_cast %11 : vector<32x8xf32> to vector<8x4x8xf32>
    %13 = tpu.transpose %12, [1, 0, 2] : vector<8x4x8xf32> -> vector<4x8x8xf32>
    %14 = vector.shape_cast %10 : vector<8x32xf32> to vector<8x4x8xf32>
    %15 = tpu.transpose %14, [1, 0, 2] : vector<8x4x8xf32> -> vector<4x8x8xf32>
    %16 = vector.shape_cast %8 : vector<16x32xf32> to vector<16x4x8xf32>
    %17 = tpu.transpose %16, [1, 0, 2] : vector<16x4x8xf32> -> vector<4x16x8xf32>
    %18 = arith.truncf %17 : vector<4x16x8xf32> to vector<4x16x8xbf16>
    %19 = arith.truncf %13 : vector<4x8x8xf32> to vector<4x8x8xbf16>
    "tpu.trace_start"() <{level = 10 : i32, message = "hnd,hkd->hnk"}> : () -> ()
    %cst_10 = arith.constant dense<0.000000e+00> : vector<4x16x8xf32>
    %20 = tpu.matmul %18, %19, %cst_10 {dimension_numbers = #tpu.dot_dimension_numbers<[2], [2], [1], [1], [0, 0, 0, 1, 1, 1], [0], [0]>} : vector<4x16x8xbf16>, vector<4x8x8xbf16>, vector<4x16x8xf32> -> vector<4x16x8xf32>
    "tpu.trace_stop"() : () -> ()
    %cst_11 = arith.constant dense<0xFF800000> : vector<4x16xf32>
    %21 = vector.multi_reduction <maximumf>, %20, %cst_11 [2] : vector<4x16x8xf32> to vector<4x16xf32>
    %22 = vector.shape_cast %21 : vector<4x16xf32> to vector<4x16x1xf32>
    %23 = vector.broadcast %22 : vector<4x16x1xf32> to vector<4x16x8xf32>
    %24 = arith.subf %20, %23 : vector<4x16x8xf32>
    %25 = math.exp %24 : vector<4x16x8xf32>
    %cst_12 = arith.constant dense<0.000000e+00> : vector<4x16xf32>
    %26 = vector.multi_reduction <add>, %25, %cst_12 [2] : vector<4x16x8xf32> to vector<4x16xf32>
    %27 = vector.shape_cast %26 : vector<4x16xf32> to vector<4x16x1xf32>
    %28 = arith.truncf %25 : vector<4x16x8xf32> to vector<4x16x8xbf16>
    %29 = arith.truncf %15 : vector<4x8x8xf32> to vector<4x8x8xbf16>
    "tpu.trace_start"() <{level = 10 : i32, message = "hnk,hkd->hnd"}> : () -> ()
    %cst_13 = arith.constant dense<0.000000e+00> : vector<4x16x8xf32>
    %30 = tpu.matmul %28, %29, %cst_13 {dimension_numbers = #tpu.dot_dimension_numbers<[2], [1], [1], [2], [0, 0, 0, 1, 1, 2], [0], [0]>} : vector<4x16x8xbf16>, vector<4x8x8xbf16>, vector<4x16x8xf32> -> vector<4x16x8xf32>
    "tpu.trace_stop"() : () -> ()
    %31 = tpu.reciprocal %27 {approx = true} : vector<4x16x1xf32> -> vector<4x16x1xf32>
    %32 = vector.broadcast %31 : vector<4x16x1xf32> to vector<4x16x8xf32>
    %33 = arith.mulf %30, %32 : vector<4x16x8xf32>
    %34 = tpu.transpose %33, [1, 0, 2] : vector<4x16x8xf32> -> vector<16x4x8xf32>
    %35 = vector.shape_cast %34 : vector<16x4x8xf32> to vector<16x32xf32>
    %c0_14 = arith.constant 0 : index
    %c0_15 = arith.constant 0 : index
    %c0_16 = arith.constant 0 : index
    %36 = vector.load %arg5[%c0_14, %c0_15, %c0_16] : memref<2x16x32xf32, #tpu.memory_space<vmem>>, vector<1x16x32xf32>
    %37 = vector.shape_cast %36 : vector<1x16x32xf32> to vector<16x32xf32>
    %38 = vector.shape_cast %35 : vector<16x32xf32> to vector<1x16x32xf32>
    tpu.vector_store %arg5[%c0_14, %c0_15, %c0_16], %38 {strides = array<i32>} : memref<2x16x32xf32, #tpu.memory_space<vmem>>, vector<1x16x32xf32>,
    %39 = vector.extract_strided_slice %5 {offsets = [16, 0], sizes = [16, 32], strides = [1, 1]} : vector<32x32xf32> to vector<16x32xf32>
    %40 = vector.extract_strided_slice %7 {offsets = [16, 0], sizes = [16, 32], strides = [1, 1]} : vector<32x32xbf16> to vector<16x32xbf16>
    %cst_17 = arith.constant dense<0.000000e+00> : vector<8x32xf32>
    %41 = tpu.matmul %4, %40, %cst_17 {dimension_numbers = #tpu.dot_dimension_numbers<[1], [0], [0], [1], [0, 0, 1, 1], [], []>} : vector<8x16xbf16>, vector<16x32xbf16>, vector<8x32xf32> -> vector<8x32xf32>
    %42 = tpu.transpose %41, [1, 0] : vector<8x32xf32> -> vector<32x8xf32>
    %43 = vector.shape_cast %42 : vector<32x8xf32> to vector<8x4x8xf32>
    %44 = tpu.transpose %43, [1, 0, 2] : vector<8x4x8xf32> -> vector<4x8x8xf32>
    %45 = vector.shape_cast %41 : vector<8x32xf32> to vector<8x4x8xf32>
    %46 = tpu.transpose %45, [1, 0, 2] : vector<8x4x8xf32> -> vector<4x8x8xf32>
    %47 = vector.shape_cast %39 : vector<16x32xf32> to vector<16x4x8xf32>
    %48 = tpu.transpose %47, [1, 0, 2] : vector<16x4x8xf32> -> vector<4x16x8xf32>
    %49 = arith.truncf %48 : vector<4x16x8xf32> to vector<4x16x8xbf16>
    %50 = arith.truncf %44 : vector<4x8x8xf32> to vector<4x8x8xbf16>
    "tpu.trace_start"() <{level = 10 : i32, message = "hnd,hkd->hnk"}> : () -> ()
    %cst_18 = arith.constant dense<0.000000e+00> : vector<4x16x8xf32>
    %51 = tpu.matmul %49, %50, %cst_18 {dimension_numbers = #tpu.dot_dimension_numbers<[2], [2], [1], [1], [0, 0, 0, 1, 1, 1], [0], [0]>} : vector<4x16x8xbf16>, vector<4x8x8xbf16>, vector<4x16x8xf32> -> vector<4x16x8xf32>
    "tpu.trace_stop"() : () -> ()
    %cst_19 = arith.constant dense<0xFF800000> : vector<4x16xf32>
    %52 = vector.multi_reduction <maximumf>, %51, %cst_19 [2] : vector<4x16x8xf32> to vector<4x16xf32>
    %53 = vector.shape_cast %52 : vector<4x16xf32> to vector<4x16x1xf32>
    %54 = vector.broadcast %53 : vector<4x16x1xf32> to vector<4x16x8xf32>
    %55 = arith.subf %51, %54 : vector<4x16x8xf32>
    %56 = math.exp %55 : vector<4x16x8xf32>
    %cst_20 = arith.constant dense<0.000000e+00> : vector<4x16xf32>
    %57 = vector.multi_reduction <add>, %56, %cst_20 [2] : vector<4x16x8xf32> to vector<4x16xf32>
    %58 = vector.shape_cast %57 : vector<4x16xf32> to vector<4x16x1xf32>
    %59 = arith.truncf %56 : vector<4x16x8xf32> to vector<4x16x8xbf16>
    %60 = arith.truncf %46 : vector<4x8x8xf32> to vector<4x8x8xbf16>
    "tpu.trace_start"() <{level = 10 : i32, message = "hnk,hkd->hnd"}> : () -> ()
    %cst_21 = arith.constant dense<0.000000e+00> : vector<4x16x8xf32>
    %61 = tpu.matmul %59, %60, %cst_21 {dimension_numbers = #tpu.dot_dimension_numbers<[2], [1], [1], [2], [0, 0, 0, 1, 1, 2], [0], [0]>} : vector<4x16x8xbf16>, vector<4x8x8xbf16>, vector<4x16x8xf32> -> vector<4x16x8xf32>
    "tpu.trace_stop"() : () -> ()
    %62 = tpu.reciprocal %58 {approx = true} : vector<4x16x1xf32> -> vector<4x16x1xf32>
    %63 = vector.broadcast %62 : vector<4x16x1xf32> to vector<4x16x8xf32>
    %64 = arith.mulf %61, %63 : vector<4x16x8xf32>
    %65 = tpu.transpose %64, [1, 0, 2] : vector<4x16x8xf32> -> vector<16x4x8xf32>
    %66 = vector.shape_cast %65 : vector<16x4x8xf32> to vector<16x32xf32>
    %c1 = arith.constant 1 : index
    %c0_22 = arith.constant 0 : index
    %c0_23 = arith.constant 0 : index
    %67 = vector.load %arg5[%c1, %c0_22, %c0_23] : memref<2x16x32xf32, #tpu.memory_space<vmem>>, vector<1x16x32xf32>
    %68 = vector.shape_cast %67 : vector<1x16x32xf32> to vector<16x32xf32>
    %69 = vector.shape_cast %66 : vector<16x32xf32> to vector<1x16x32xf32>
    tpu.vector_store %arg5[%c1, %c0_22, %c0_23], %69 {strides = array<i32>} : memref<2x16x32xf32, #tpu.memory_space<vmem>>, vector<1x16x32xf32>,
    return
  }
  func.func @transform_0(%arg0: i32) -> (i32, i32, i32) {
    %c0_i32 = arith.constant 0 : i32
    %c0_i32_0 = arith.constant 0 : i32
    %c0_i32_1 = arith.constant 0 : i32
    return %arg0, %c0_i32, %c0_i32_0 : i32, i32, i32
  }
  func.func @transform_1(%arg0: i32) -> (i32, i32) {
    %c0_i32 = arith.constant 0 : i32
    %c0_i32_0 = arith.constant 0 : i32
    %c0_i32_1 = arith.constant 0 : i32
    return %c0_i32, %c0_i32_0 : i32, i32
  }
  func.func @transform_2(%arg0: i32) -> (i32, i32) {
    %c0_i32 = arith.constant 0 : i32
    %c0_i32_0 = arith.constant 0 : i32
    %c0_i32_1 = arith.constant 0 : i32
    return %c0_i32, %c0_i32_0 : i32, i32
  }
  func.func @transform_3(%arg0: i32) -> (i32, i32) {
    %c0_i32 = arith.constant 0 : i32
    %c0_i32_0 = arith.constant 0 : i32
    %c0_i32_1 = arith.constant 0 : i32
    return %c0_i32, %c0_i32_0 : i32, i32
  }
  func.func @transform_4(%arg0: i32) -> (i32, i32, i32) {
    %c0_i32 = arith.constant 0 : i32
    %c0_i32_0 = arith.constant 0 : i32
    %c0_i32_1 = arith.constant 0 : i32
    return %arg0, %c0_i32, %c0_i32_0 : i32, i32, i32
  }
}

</mosaic_0001>

<bundles_post_ra>
// kernel: tpu_custom_call.1
= control target key start
LH: loop header
LB: loop body
LE: loop exit
PB: predicated region body
PF: predicated region fallthrough
CT: control target
= control target key end

     0   :  { %9 = vsyncpa [#allocation3], 0  ;;  %s4631_s0 = inlined_call_operand.hbm [shape: bf16[4,16,32], index: 0, kind: input, shape index: {}]   ;;  %s4632_s1 = inlined_call_operand.hbm [shape: bf16[32,32], index: 1, kind: input, shape index: {}]   ;;  %s4633_s2 = inlined_call_operand.hbm [shape: bf16[32,32], index: 2, kind: input, shape index: {}]   ;;  %s4634_s3 = inlined_call_operand.vmem [shape: bf16[8,16], index: 3, kind: input, shape index: {}]   ;;  %s4635_s4 = inlined_call_operand.hbm [shape: f32[4,16,32], index: 4, kind: output, shape index: {}]  }
   0x1   :  { %11 = vsyncpa [#allocation3 + $0x1], 0 }
   0x2   :  { %12 = vsyncpa [#allocation6], 0 }
   0x3   :  { %13 = vsyncpa [#allocation4], 0 }
   0x4   :  { %15 = vsyncpa [#allocation4 + $0x1], 0  ;;  %s3890_s15 = smov 0   ;;  %s3892_s16 = smov 0  }
   0x5   :  { %s3894_s17 = smov 0   ;;  %s3896_s18 = smov 0  }
   0x6 LB: > { %s3911_s19 = sadd.s32 4294967295, %s3846_s18   ;;  %s3298_s20 = sadd.s32 4294967294, %s3846_s18   ;;  %s3846_s18 = sphi %s3896_s18, %s4656_s18   ;;  %s3842_s17 = sphi %s3894_s17, %s4655_s17   ;;  %s3838_s16 = sphi %s3892_s16, %s4654_s16   ;;  %s3834_s15 = sphi %s3890_s15, %s4653_s15  }
   0x7   : > { %p41_p0 = scmp.ne.s32.totalorder %s3838_s16, %s3834_s15  ;;  %p4636_p1 = scmp.eq.s32.totalorder %s3911_s19, 0 }
   0x8   : > { %p128_p2 = scmp.eq.s32.totalorder %s3911_s19, 1  ;;  %p134_p3 = scmp.eq.s32.totalorder %s3298_s20, 1 }
   0x9   : > { %p3920_p4 = por %p4636_p1, %p41_p0  ;;  %p3299_p5 = scmp.ge.s32.totalorder %s3846_s18, 1 }
   0xa   : > { %p3925_p6 = por %p134_p3, %p41_p0  ;;  %p141_p7 = scmp.lt.s32.totalorder %s3846_s18, 3 }
   0xb   : > { %s4640_s21 = scalar_select %p3920_p4, 1, 0 }
   0xc   : > { %s4641_s22 = scalar_select %p3925_p6, 1, 0 }
   0xd   : > { %p3930_p8 = pnand %p3299_p5, %p141_p7  ;;  %s3848_s24 = smov [#allocation5]  }
   0xe   : > { %s153_s25 = sshll.u32 %s3848_s24, 4  ;;  %s3849_s27 = smov [#allocation7]   ;;  %s154_s25 = int_to_ptr.vmem [resolvable:$true] %s153_s25 }
   0xf   : > { %s4642_s23 = scalar_select %p3930_p8, 1, 0 }
  0x10   : > { %p3560_p9 = pneg %p3930_p8  ;;  %s166_s28 = sshll.u32 %s3849_s27, 4  ;;  %s167_s28 = int_to_ptr.vmem [resolvable:$true] %s166_s28 }
  0x11   : > { %s3709_s29 = scalar_lea.vmem %s154_s25, 256  ;;  %p3717_p5 = scmp.lt.s32.totalorder %s154_s25, %s154_s25 }
  0x12   : > { %p3939_p11 = pnand %p3560_p9, %p4636_p1  ;;  %p3710_p13 = scmp.ne.s32.totalorder %s154_s25, %s3709_s29 }
  0x13   : > { %p3718_p7 = scmp.lt.s32.totalorder %s3709_s29, %s3709_s29 }
  0x14   : > { %p3700_p12 = pneg %p3939_p11 }
  0x15   : > { %p3719_p10 = por %p3718_p7, %p3717_p5 }
  0x16   : > { %p3712_p0 = pnand %p3710_p13, %p3700_p12 }
  0x18   : > { %p3713_p3 = pneg %p3712_p0 }
  0x1a   : > { %p3720_p9 = pnand %p3719_p10, %p3713_p3 }
  0x1c   : > { %3723 = shalt.err (!%p3720_p9)
}
  0x1d   : > { %s3850_s30 = smov 64   ;;  %s3851_s5 = smov 4  }
  0x1e   : > { %3563 = dma.hbm_to_vmem [thread:$0]  (!%p3939_p11), %s4632_s1, 256, %s154_s25, [#allocation6], %s3850_s30, %s3850_s30, %s3851_s5  }
  0x1f   : > { %s3735_s8 = scalar_lea.vmem %s167_s28, 256  ;;  %p3743_p10 = scmp.lt.s32.totalorder %s167_s28, %s167_s28 }
  0x20   : > { %p3736_p13 = scmp.ne.s32.totalorder %s167_s28, %s3735_s8  ;;  %p3744_p3 = scmp.lt.s32.totalorder %s3735_s8, %s3735_s8 }
  0x22   : > { %p3738_p0 = pnand %p3736_p13, %p3700_p12  ;;  %p3745_p7 = por %p3744_p3, %p3743_p10 }
  0x24   : > { %p3739_p5 = pneg %p3738_p0 }
  0x26   : > { %p3746_p9 = pnand %p3745_p7, %p3739_p5 }
  0x28   : > { %3749 = shalt.err (!%p3746_p9)
}
  0x29   : > { %3566 = dma.hbm_to_vmem [thread:$0]  (!%p3939_p11), %s4633_s2, 256, %s167_s28, [#allocation6], %s3850_s30, %s3850_s30, %s3851_s5  }
  0x2a   : > { %s3968_s11 = sadd.s32 1, %s3846_s18   ;;  %s28_s12 = sadd.s32 1, %s3842_s17 }
  0x2b   : > { %s25_s13 = ssub.s32 %s3846_s18, %s3968_s11  ;;  %p35_p12 = scmp.ne.s32.totalorder %s3842_s17, %s3838_s16 }
  0x2c   : > { %p26_p13 = scmp.eq.s32.totalorder %s25_s13, 0  ;;  %p36_p0 = scmp.eq.s32.totalorder %s3846_s18, 0 }
  0x2d   : > { %p3978_p5 = por %p128_p2, %p35_p12  ;;  %p3577_p10 = scmp.lt.s32.totalorder %s3846_s18, 2 }
  0x2e   : > { %s3984_s20 = scalar_select %p26_p13, %s3842_s17, %s28_s12  }
  0x2f   : > { %s4644_s14 = scalar_select %p3978_p5, 1, 0 }
  0x30   : > { %p37_p3 = por %p36_p0, %p35_p12  ;;  %s183_s24 = sand.u32 1, %s3842_s17  }
  0x31   : > { %s3303_s25 = sshll.u32 %s183_s24, 4  ;;  %s3377_s26 = sshll.u32 %s3846_s18, 8 }
  0x32   : > { %s3991_s29 = scalar_lea.hbm %s4631_s0, %s3377_s26  ;;  %s187_s6 = scalar_lea.vmem [#allocation2], %s3303_s25 }
  0x33   : > { %s195_s7 = sshll.u32 %s187_s6, 4  ;;  %p3995_p2 = pnand %p3577_p10, %p37_p3  ;;  %s3993_s7 = int_to_ptr.vmem [resolvable:$true] %s195_s7 }
  0x34   : > { %s3999_s9 = scalar_lea.sflag [#allocation3], %s183_s24  ;;  %s3750_s10 = scalar_lea.hbm %s3991_s29, 256 }
  0x35   : > { %p3751_p11 = scmp.ne.s32.totalorder %s3991_s29, %s3750_s10  ;;  %p3752_p7 = pneg %p3995_p2 }
  0x36   : > { %s3755_s25 = scalar_lea.hbm %s4631_s0, 512  ;;  %p3756_p13 = scmp.lt.s32.totalorder %s3991_s29, %s4631_s0 }
  0x37   : > { %p3753_p9 = pnand %p3752_p7, %p3751_p11  ;;  %p3757_p0 = scmp.lt.s32.totalorder %s3755_s25, %s3750_s10 }
  0x39   : > { %p3754_p12 = pneg %p3753_p9  ;;  %p3758_p10 = por %p3757_p0, %p3756_p13 }
  0x3b   : > { %p3759_p3 = pnand %p3758_p10, %p3754_p12 }
  0x3d   : > { %3762 = shalt.err (!%p3759_p3)
}
  0x3e   : > { %s3763_s24 = scalar_lea.vmem %s3993_s7, 256  ;;  %s3852_s28 = smov [#allocation2]  }
  0x3f   : > { %p3764_p1 = scmp.ne.s32.totalorder %s3993_s7, %s3763_s24  ;;  %s3768_s6 = sshll.u32 %s3852_s28, 4  ;;  %s3769_s6 = int_to_ptr.vmem [resolvable:$false] %s3768_s6 }
  0x40   : > { %s3770_s12 = scalar_lea.vmem %s3769_s6, 512  ;;  %p3771_p9 = scmp.lt.s32.totalorder %s3993_s7, %s3769_s6 }
  0x41   : > { %p3766_p6 = pnand %p3764_p1, %p3752_p7  ;;  %p3772_p5 = scmp.lt.s32.totalorder %s3770_s12, %s3763_s24 }
  0x43   : > { %p3767_p11 = pneg %p3766_p6  ;;  %p3773_p4 = por %p3772_p5, %p3771_p9 }
  0x45   : > { %p3774_p8 = pnand %p3773_p4, %p3767_p11 }
  0x47   : > { %3777 = shalt.err (!%p3774_p8)
}
  0x48   : > { %3570 = dma.hbm_to_vmem [thread:$0]  (!%p3995_p2), %s3991_s29, 256, %s3993_s7, %s3999_s9, %s3850_s30, %s3850_s30, %s3851_s5  }
  0x49   : > { %p4646_p1 = scmp.ne.s32.totalorder %s4642_s23, 0 }
  0x4a   : > { %s4026_s10 = sand.u32 (!%p4646_p1), 1, %s3838_s16   ;;  %p4647_p4 = scmp.ne.s32.totalorder (!%p4646_p1), %s4640_s21, 0 }
  0x4b   : > { %207 = sbr.rel (%p4646_p1) target bundleno = 2188 (0x88c), region = 36  ;;  %s3308_s13 = sshll.u32 (!%p4646_p1), %s4026_s10, 4 }
  0x4c   : > { %s210_s25 = scalar_lea.sflag (!%p4646_p1), [#allocation3], %s4026_s10  ;;  %s213_s26 = scalar_lea.vmem (!%p4646_p1), [#allocation2], %s3308_s13 }
  0x50   : > { %3821 = dma.done.wait (%p4647_p4), %s210_s25, 256  }
  0x51   : > { %3823 = vsyncadd (%p4647_p4), %s210_s25, 4294967040  ;;  %p4648_p6 = scmp.eq.s32.totalorder %s3911_s19, 0 }
  0x53   : > { %3825 = dma.done.wait (%p4648_p6), [#allocation6], 512   ;;  %p4649_p8 = pmov %p4648_p6 }
  0x54   : > { %v3628_v0 = vld [vmem:[#allocation7 + $0x8] sm:$0xff]   ;;  %v3629_v1 = vld [vmem:[#allocation7] sm:$0xff]   ;;  %vm284_vm0 = vcmask 261120   ;;  %v3632_v3 = vld [vmem:[#allocation5 + $0x8] sm:$0xff]   ;;  %v3853_v6 = vmov 0.0   ;;  %vm3854_vm1 = vmmov 0   ;;  %v495_v26 = vlaneseq }
  0x55   : > { %3827 = vsyncadd (%p4649_p8), [#allocation6], 4294966784  ;;  %3432 = vmatprep.subr.bf16.mxu1 %v3628_v0  ;;  %v3630_v2 = vld [vmem:[%s213_s26] sm:$0xff]   ;;  %v3631_v5 = vld [vmem:[%s213_s26 + $0x8] sm:$0xff]   ;;  %3424 = vmatprep.subr.bf16.mxu0 %v3632_v3  ;;  %s3855_s21 = smov 112   ;;  %s3856_s23 = smov 120  }
  0x56   : > { %3433 = vmatpush3.bf16.msra.mxu1 %v3628_v0  ;;  %3436 = vmatprep.mubr.msk.bf16.mxu1 %vm284_vm0, %v3630_v2  ;;  %v3633_v4 = vld [vmem:[#allocation5] sm:$0xff]   ;;  %vm403_vm2 = vcmask 130048   ;;  %s3857_s29 = smov 104   ;;  %v3858_v24 = vmov 1983009808   ;;  %v496_v30 = vshrl.u32 %v495_v26, 7 }
  0x57   : > { %3434 = vmatprep.subr.bf16.mxu1 %v3629_v1  ;;  %3428 = vmatprep.mubr.msk.bf16.mxu0 %vm284_vm0, %v3630_v2  ;;  %v4063_v16 = vld [vmem:[%s4634_s3] sm:$0xf]  ;;  %v493_v25 = vunpack.c.l.s4 %v3858_v24  ;;  %v3859_v35 = vmov 1934713408   ;;  %vm1021_vm3 = vcmask 64512   ;;  %vm1293_vm4 = vcmask 1043456  }
  0x58   : > { %3425 = vmatpush3.bf16.msra.mxu0 %v3632_v3  ;;  %v510_v36 = vunpack.c.l.s4 %v3859_v35  ;;  %s3860_s7 = smov 8   ;;  %s3861_s8 = smov 16   ;;  %vm1795_vm5 = vcmask 195584  }
  0x59   : > { %3426 = vmatprep.subr.bf16.mxu0 %v3633_v4  ;;  %v494_v29 = vunpack.c.0.s8 %v493_v25  ;;  %s3862_s9 = smov 24   ;;  %s3311_s27 = sshll.u32 %s4026_s10, 5 }
  0x5a   : > { %3435 = vmatpush3.bf16.msra.mxu1 %v3629_v1  ;;  %v511_v45 = vunpack.c.0.s8 %v510_v36  ;;  %s4520_s24 = scalar_lea.vmem [#allocation8], %s3311_s27  ;;  %s3379_s6 = sshll.u32 %s3911_s19, 9 }
  0x5b   : > { %3446 = vmatprep.subr.bf16.mxu1 %v3853_v6  ;;  %v4077_v33 = vsub.s32 %v494_v29, %v496_v30  ;;  %s3206_s28 = sshll.u32 %s4520_s24, 4  ;;  %s4584_s25 = scalar_lea.hbm %s4635_s4, %s3379_s6  ;;  %s4577_s28 = int_to_ptr.vmem [resolvable:$true] %s3206_s28 }
  0x5c   : > { %3427 = vmatpush3.bf16.msra.mxu0 %v3633_v4  ;;  %v4087_v53 = vsub.s32 %v511_v45, %v496_v30  ;;  %s3192_s19 = scalar_lea.sflag [#allocation4], %s4026_s10  ;;  %s3778_s26 = scalar_lea.vmem %s4577_s28, 512 }
  0x5d   : > { %3437 = vmatmul.mubr.msk.bf16.vlgmr.msra.gmra.mxu1 %vm284_vm0, %v3631_v5  ;;  %3440 = vmatprep.subr.bf16.mxu0 %v3853_v6  ;;  %p3779_p5 = scmp.ne.s32.totalorder %s4577_s28, %s3778_s26  ;;  %p4650_p2 = scmp.ne.s32.totalorder %s4644_s14, 0 }
  0x5e   : > { %3448 = vmatprep.mubr.msk.bf16.mxu1 %vm3854_vm1, %v3853_v6 }
  0x5f   : > { %3429 = vmatmul.mubr.msk.bf16.vlgmr.msra.gmra.mxu0 %vm284_vm0, %v3631_v5  ;;  %p3780_p7 = pnand %p3779_p5, %p4650_p2 }
  0x60   : > { %3442 = vmatprep.mubr.msk.bf16.mxu0 %vm3854_vm1, %v3853_v6 }
  0x61   : > { %p3781_p12 = pneg %p3780_p7 }
 0x11d   : > { %v4048_v7 = vpop.f32.mrf.mxu1 }
 0x11f   : > { %v386_v8 = vpop.f32.mrf.mxu1  ;;  %v4052_v10 = vpop.f32.mrf.mxu0 }
 0x121   : > { %v4050_v9 = vpop.f32.mrf.mxu1  ;;  %v325_v13 = vpop.f32.mrf.mxu0 }
 0x122   : > { %v402_v11 = vpack.c.bf16 %v4050_v9, %v4048_v7  ;;  %713 = vrot.lane.b32.xlu1 %v325_v13, %s3855_s21  ;;  %707 = vrot.lane.b32.xlu0 %v325_v13, %s3856_s23 }
 0x123   : > { %v389_v12 = vpop.f32.mrf.mxu1  ;;  %v4058_v15 = vpop.f32.mrf.mxu0 }
 0x124   : > { %v401_v14 = vpack.c.bf16 %v389_v12, %v386_v8 }
 0x125   : > { %v328_v17 = vpop.f32.mrf.mxu0 }
 0x126   : > { %3441 = vmatpush3.bf16.msra.mxu0 %v401_v14  ;;  %719 = vrot.lane.b32.xlu0 %v325_v13, %s3857_s29 }
 0x127   : > { %3452 = vmatprep.subr.bf16.mxu0 %v3853_v6  ;;  %715 = vrot.lane.b32.xlu1 %v328_v17, %s3855_s21 }
 0x129   : > { %3443 = vmatmul.mubr.msk.bf16.vlgmr.msra.gmra.mxu0 %vm403_vm2, %v4063_v16 }
 0x12a   : > { %3454 = vmatprep.mubr.msk.bf16.mxu0 %vm3854_vm1, %v3853_v6  ;;  %709 = vrot.lane.b32.xlu0 %v328_v17, %s3856_s23 }
 0x12b   : > { %721 = vrot.lane.b32.xlu1 %v328_v17, %s3857_s29 }
 0x194   : > { %v714_v22 = vpop.permute.xlu1 %713  ;;  %v708_v23 = vpop.permute.xlu0 %707 }
 0x195   : > { %v725_v34 = vcombine.low %v325_v13, %v714_v22  ;;  %v726_v38 = vcombine.high %v325_v13, %v714_v22 }
 0x197   : > { %v733_v44 = vrot.slane %v725_v34, %v4077_v33  ;;  %v740_v47 = vrot.slane %v726_v38, %v4077_v33 }
 0x198   : > { %v720_v27 = vpop.permute.xlu0 %719 }
 0x199   : > { %v716_v28 = vpop.permute.xlu1 %715  ;;  %v741_v37 = vcombine.low %v708_v23, %v720_v27  ;;  %v742_v39 = vcombine.high %v708_v23, %v720_v27 }
 0x19a   : > { %v793_v40 = vcombine.low %v328_v17, %v716_v28  ;;  %v794_v41 = vcombine.high %v328_v17, %v716_v28 }
 0x19b   : > { %v749_v46 = vrot.slane %v741_v37, %v4077_v33  ;;  %v756_v48 = vrot.slane %v742_v39, %v4077_v33 }
 0x19c   : > { %v710_v32 = vpop.permute.xlu0 %709  ;;  %v801_v49 = vrot.slane %v793_v40, %v4077_v33  ;;  %v808_v50 = vrot.slane %v794_v41, %v4077_v33 }
 0x19d   : > { %v722_v31 = vpop.permute.xlu1 %721  ;;  %v757_v54 = vcombine.low %v733_v44, %v749_v46  ;;  %v758_v55 = vcombine.high %v733_v44, %v749_v46  ;;  %v773_v57 = vcombine.low %v740_v47, %v756_v48  ;;  %v774_v58 = vcombine.high %v740_v47, %v756_v48 }
 0x19e   : > { %v809_v42 = vcombine.low %v710_v32, %v722_v31  ;;  %v810_v43 = vcombine.high %v710_v32, %v722_v31 }
 0x19f   : > { %v765_v63 = vrot.slane %v757_v54, %v4087_v53  ;;  %v772_v0 = vrot.slane %v758_v55, %v4087_v53  ;;  %v781_v2 = vrot.slane %v773_v57, %v4087_v53  ;;  %v788_v3 = vrot.slane %v774_v58, %v4087_v53 }
 0x1a0   : > { %v817_v51 = vrot.slane %v809_v42, %v4077_v33  ;;  %v824_v52 = vrot.slane %v810_v43, %v4077_v33 }
 0x1a1   : > { %v861_v17 = vcombine.low %v765_v63, %v772_v0  ;;  %v3328_v22 = vcombine.high %v781_v2, %v788_v3 }
 0x1a2   : > { %v825_v59 = vcombine.low %v801_v49, %v817_v51  ;;  %v826_v60 = vcombine.high %v801_v49, %v817_v51  ;;  %v841_v61 = vcombine.low %v808_v50, %v824_v52  ;;  %v842_v62 = vcombine.high %v808_v50, %v824_v52 }
 0x1a3   : > { %v868_v29 = vrot.slane %v861_v17, %v4077_v33  ;;  %v892_v36 = vrot.slane %v3328_v22, %v4077_v33 }
 0x1a4   : > { %v833_v4 = vrot.slane %v825_v59, %v4087_v53  ;;  %v840_v5 = vrot.slane %v826_v60, %v4087_v53  ;;  %v849_v8 = vrot.slane %v841_v61, %v4087_v53  ;;  %v856_v12 = vrot.slane %v842_v62, %v4087_v53 }
 0x1a6   : > { %v929_v23 = vcombine.low %v833_v4, %v840_v5  ;;  %v3329_v24 = vcombine.high %v833_v4, %v840_v5  ;;  %v945_v25 = vcombine.low %v849_v8, %v856_v12  ;;  %v3330_v26 = vcombine.high %v849_v8, %v856_v12 }
 0x1a8   : > { %v936_v37 = vrot.slane %v929_v23, %v4077_v33  ;;  %v944_v38 = vrot.slane %v3329_v24, %v4077_v33  ;;  %v952_v39 = vrot.slane %v945_v25, %v4077_v33  ;;  %v960_v40 = vrot.slane %v3330_v26, %v4077_v33 }
 0x1aa   : > { %v961_v48 = vcombine.low %v936_v37, %v944_v38  ;;  %v977_v49 = vcombine.low %v952_v39, %v960_v40  ;;  %v962_v8 = vcombine.high %v936_v37, %v944_v38 }
 0x1ac   : > { %v969_v59 = vrot.slane %v961_v48, %v4087_v53  ;;  %v985_v60 = vrot.slane %v977_v49, %v4087_v53  ;;  %v976_v24 = vrot.slane %v962_v8, %v4087_v53 }
 0x1ae   : > { %v993_v17 = vcombine.low %v969_v59, %v985_v60 }
 0x1e9   : > { %v4074_v18 = vpop.f32.mrf.mxu0 }
 0x1ea   : > { %447 = vxpose.xlu0.b32.start.end [1/1] (short) (narrow) %v4074_v18, 32 }
 0x1eb   : > { %v3444_v19 = vpop.f32.mrf.mxu0 }
 0x1ed   : > { %v444_v20 = vpop.f32.mrf.mxu0 }
 0x1ee   : > { %v3327_v20 = vcombine.high %v765_v63, %v772_v0 }
 0x1ef   : > { %v3445_v21 = vpop.f32.mrf.mxu0 }
 0x1f0   : > { %v877_v21 = vcombine.low %v781_v2, %v788_v3  ;;  %v876_v31 = vrot.slane %v3327_v20, %v4077_v33 }
 0x1f2   : > { %v884_v32 = vrot.slane %v877_v21, %v4077_v33  ;;  %v893_v46 = vcombine.low %v868_v29, %v876_v31  ;;  %v894_v0 = vcombine.high %v868_v29, %v876_v31 }
 0x1f4   : > { %v909_v47 = vcombine.low %v884_v32, %v892_v36  ;;  %v901_v57 = vrot.slane %v893_v46, %v4087_v53  ;;  %v908_v22 = vrot.slane %v894_v0, %v4087_v53 }
 0x1f6   : > { %v917_v58 = vrot.slane %v909_v47, %v4087_v53 }
 0x1f8   : > { %v925_v12 = vcombine.low %v901_v57, %v917_v58 }
 0x1fa   : > { %v997_v26 = vpack.c.bf16 %v993_v17, %v925_v12 }
 0x266   : > { %v463_v56 = vpop.trf.xlu0 }
 0x26a   : > { %v464_v1 = vpop.trf.xlu0 }
 0x26b   : > { %v491_v13 = vcombine.low %v463_v56, %v464_v1  ;;  %v3323_v14 = vcombine.high %v463_v56, %v464_v1  ;;  %v910_v1 = vcombine.high %v884_v32, %v892_v36 }
 0x26d   : > { %v498_v27 = vrot.slane %v491_v13, %v4077_v33  ;;  %v506_v28 = vrot.slane %v3323_v14, %v4077_v33  ;;  %v926_v13 = vcombine.high %v901_v57, %v917_v58  ;;  %v978_v14 = vcombine.high %v952_v39, %v960_v40 }
 0x26e   : > { %v465_v19 = vpop.trf.xlu0  ;;  %v924_v23 = vrot.slane %v910_v1, %v4087_v53 }
 0x26f   : > { %v507_v41 = vcombine.low %v498_v27, %v506_v28  ;;  %v508_v50 = vcombine.high %v498_v27, %v506_v28  ;;  %v992_v25 = vrot.slane %v978_v14, %v4087_v53 }
 0x270   : > { %v928_v32 = vcombine.high %v908_v22, %v924_v23 }
 0x271   : > { %v515_v51 = vrot.slane %v507_v41, %v4087_v53  ;;  %v522_v61 = vrot.slane %v508_v50, %v4087_v53  ;;  %v995_v31 = vcombine.low %v976_v24, %v992_v25 }
 0x272   : > { %v466_v30 = vpop.trf.xlu0 }
 0x273   : > { %v525_v34 = vcombine.low %v465_v19, %v466_v30  ;;  %v3324_v35 = vcombine.high %v465_v19, %v466_v30  ;;  %v994_v19 = vcombine.high %v969_v59, %v985_v60  ;;  %v927_v30 = vcombine.low %v908_v22, %v924_v23 }
 0x275   : > { %v532_v42 = vrot.slane %v525_v34, %v4077_v33  ;;  %v540_v43 = vrot.slane %v3324_v35, %v4077_v33  ;;  %v998_v27 = vpack.c.bf16 %v994_v19, %v926_v13  ;;  %v996_v34 = vcombine.high %v976_v24, %v992_v25 }
 0x276   : > { %v999_v35 = vpack.c.bf16 %v995_v31, %v927_v30 }
 0x277   : > { %v541_v44 = vcombine.low %v532_v42, %v540_v43  ;;  %v542_v45 = vcombine.high %v532_v42, %v540_v43  ;;  %v1000_v36 = vpack.c.bf16 %v996_v34, %v928_v32 }
 0x279   : > { %v549_v52 = vrot.slane %v541_v44, %v4087_v53  ;;  %v556_v54 = vrot.slane %v542_v45, %v4087_v53 }
 0x27b   : > { %v1009_v55 = vcombine.low %v515_v51, %v549_v52  ;;  %v3331_v56 = vcombine.high %v515_v51, %v549_v52  ;;  %v1011_v4 = vcombine.low %v522_v61, %v556_v54  ;;  %v3332_v5 = vcombine.high %v522_v61, %v556_v54 }
 0x27d   : > { %v1017_v62 = vpack.c.bf16 %v1009_v55, %v1009_v55  ;;  %v1018_v63 = vpack.c.bf16 %v3331_v56, %v3331_v56  ;;  %v1019_v20 = vpack.c.bf16 %v1011_v4, %v1011_v4  ;;  %v1020_v21 = vpack.c.bf16 %v3332_v5, %v3332_v5 }
 0x27f   : > { %v1026_v2 = vsel %vm1021_vm3, %v1017_v62, 0  ;;  %v1073_v3 = vsel %vm1021_vm3, %v1018_v63, 0  ;;  %v1120_v28 = vsel %vm1021_vm3, %v1019_v20, 0  ;;  %v1167_v29 = vsel %vm1021_vm3, %v1020_v21, 0 }
 0x280   : > { %3447 = vmatpush3.bf16.xpose.msra.mxu1 %v1026_v2  ;;  %3453 = vmatpush3.bf16.xpose.msra.mxu0 %v1073_v3 }
 0x281   : > { %3458 = vmatprep.subr.bf16.mxu1 %v3853_v6  ;;  %3464 = vmatprep.subr.bf16.mxu0 %v3853_v6 }
 0x287   : > { %3449 = vmatmul.mubr.msk.bf16.vlgmr.msra.gmra.mxu1 %vm1021_vm3, %v997_v26  ;;  %3455 = vmatmul.mubr.msk.bf16.vlgmr.msra.gmra.mxu0 %vm1021_vm3, %v998_v27 }
 0x288   : > { %3459 = vmatpush3.bf16.xpose.msra.mxu1 %v1120_v28  ;;  %3465 = vmatpush3.bf16.xpose.msra.mxu0 %v1167_v29 }
 0x289   : > { %3460 = vmatprep.mubr.msk.bf16.mxu1 %vm3854_vm1, %v3853_v6  ;;  %3466 = vmatprep.mubr.msk.bf16.mxu0 %vm3854_vm1, %v3853_v6 }
 0x28a   : > { %3470 = vmatprep.subr.bf16.mxu1 %v3853_v6  ;;  %3476 = vmatprep.subr.bf16.mxu0 %v3853_v6 }
 0x28f   : > { %3461 = vmatmul.mubr.msk.bf16.vlgmr.msra.gmra.mxu1 %vm1021_vm3, %v999_v35  ;;  %3467 = vmatmul.mubr.msk.bf16.vlgmr.msra.gmra.mxu0 %vm1021_vm3, %v1000_v36 }
 0x290   : > { %3472 = vmatprep.mubr.msk.bf16.mxu1 %vm3854_vm1, %v3853_v6  ;;  %3478 = vmatprep.mubr.msk.bf16.mxu0 %vm3854_vm1, %v3853_v6 }
 0x347   : > { %v1062_v37 = vpop.f32.mrf.mxu1  ;;  %v4141_v38 = vpop.f32.mrf.mxu0 }
 0x348   : > { %v1210_v39 = vsel %vm1021_vm3, %v1062_v37, -inf  ;;  %v1216_v57 = vsel %vm1021_vm3, %v4141_v38, -inf }
 0x349   : > { %1211 = vmax.xlane.f32.xlu1 %v1210_v39  ;;  %v3450_v40 = vpop.f32.mrf.mxu1  ;;  %v3456_v41 = vpop.f32.mrf.mxu0 }
 0x34b   : > { %v1065_v42 = vpop.f32.mrf.mxu1  ;;  %v4144_v43 = vpop.f32.mrf.mxu0 }
 0x34c   : > { %v1213_v44 = vsel %vm1021_vm3, %v1065_v42, -inf  ;;  %v1219_v58 = vsel %vm1021_vm3, %v4144_v43, -inf }
 0x34d   : > { %1214 = vmax.xlane.f32.xlu0 %v1213_v44  ;;  %v3451_v45 = vpop.f32.mrf.mxu1  ;;  %v3457_v46 = vpop.f32.mrf.mxu0 }
 0x34f   : > { %v4147_v47 = vpop.f32.mrf.mxu1  ;;  %v4149_v48 = vpop.f32.mrf.mxu0 }
 0x350   : > { %v1222_v59 = vsel %vm1021_vm3, %v4147_v47, -inf  ;;  %v1228_v60 = vsel %vm1021_vm3, %v4149_v48, -inf }
 0x351   : > { %v3462_v49 = vpop.f32.mrf.mxu1  ;;  %v3468_v50 = vpop.f32.mrf.mxu0 }
 0x353   : > { %v4151_v51 = vpop.f32.mrf.mxu1  ;;  %v4153_v52 = vpop.f32.mrf.mxu0 }
 0x354   : > { %v1225_v54 = vsel %vm1021_vm3, %v4151_v51, -inf  ;;  %v1231_v61 = vsel %vm1021_vm3, %v4153_v52, -inf }
 0x355   : > { %1226 = vmax.xlane.f32.xlu0 %v1225_v54  ;;  %v3463_v55 = vpop.f32.mrf.mxu1  ;;  %v3469_v56 = vpop.f32.mrf.mxu0 }
 0x359   : > { %1217 = vmax.xlane.f32.xlu0 %v1216_v57 }
 0x35a   : > { %560 = vrot.lane.b32.xlu1 %v4074_v18, %s3856_s23 }
 0x35d   : > { %1220 = vmax.xlane.f32.xlu0 %v1219_v58 }
 0x35e   : > { %563 = vrot.lane.b32.xlu1 %v4074_v18, %s3855_s21 }
 0x362   : > { %566 = vrot.lane.b32.xlu1 %v4074_v18, %s3857_s29 }
 0x373   : > { %2102 = vrot.lane.b32.xlu0 %v4058_v15, %s3856_s23 }
 0x377   : > { %2112 = vrot.lane.b32.xlu0 %v4052_v10, %s3857_s29 }
 0x386   : > { %1223 = vmax.xlane.f32.xlu1 %v1222_v59 }
 0x38a   : > { %1229 = vmax.xlane.f32.xlu1 %v1228_v60 }
 0x396   : > { %1232 = vmax.xlane.f32.xlu0 %v1231_v61 }
 0x39b   : > { %2100 = vrot.lane.b32.xlu1 %v4052_v10, %s3856_s23 }
 0x39f   : > { %2106 = vrot.lane.b32.xlu1 %v4052_v10, %s3855_s21 }
 0x3a3   : > { %2108 = vrot.lane.b32.xlu1 %v4058_v15, %s3855_s21 }
 0x3a7   : > { %2114 = vrot.lane.b32.xlu1 %v4058_v15, %s3857_s29 }
 0x3d2   : > { %v1212_v62 = vpop.xlane.xlu1 %1211 }
 0x3d3   : > { %v1234_v5 = vsub.f32 %v1062_v37, %v1212_v62 }
 0x3d5   : > { %v1242_v23 = vmul.f32 1.442695, %v1234_v5 }
 0x3d6   : > { %v561_v63 = vpop.permute.xlu1 %560  ;;  %v1215_v0 = vpop.xlane.xlu0 %1214 }
 0x3d7   : > { %v1235_v2 = vsub.f32 %v1065_v42, %v1215_v0 }
 0x3d9   : > { %v1244_v17 = vmul.f32 1.442695, %v1235_v2 }
 0x3da   : > { %v564_v1 = vpop.permute.xlu1 %563 }
 0x3db   : > { %v569_v3 = vcombine.low %v4074_v18, %v564_v1  ;;  %v570_v4 = vcombine.high %v4074_v18, %v564_v1  ;;  %3634 = vpow2.f32 %v1244_v17 }
 0x3dc   : > { %3636 = vpow2.f32 %v1242_v23 }
 0x3dd   : > { %v577_v19 = vrot.slane %v569_v3, %v4077_v33  ;;  %v584_v20 = vrot.slane %v570_v4, %v4077_v33 }
 0x3de   : > { %v567_v8 = vpop.permute.xlu1 %566  ;;  %v4187_v12 = vpop.xlane.xlu0 %1226 }
 0x3df   : > { %v585_v13 = vcombine.low %v561_v63, %v567_v8  ;;  %v586_v14 = vcombine.high %v561_v63, %v567_v8 }
 0x3e1   : > { %v593_v21 = vrot.slane %v585_v13, %v4077_v33  ;;  %v600_v22 = vrot.slane %v586_v14, %v4077_v33 }
 0x3e2   : > { %v1218_v24 = vpop.xlane.xlu0 %1217 }
 0x3e3   : > { %v601_v25 = vcombine.low %v577_v19, %v593_v21  ;;  %v602_v26 = vcombine.high %v577_v19, %v593_v21  ;;  %v617_v18 = vcombine.low %v584_v20, %v600_v22  ;;  %v618_v27 = vcombine.high %v584_v20, %v600_v22 }
 0x3e4   : > { %v1236_v28 = vsub.f32 %v4141_v38, %v1218_v24  ;;  %v1239_v22 = vsub.f32 %v4151_v51, %v4187_v12 }
 0x3e5   : > { %v609_v29 = vrot.slane %v601_v25, %v4087_v53  ;;  %v616_v30 = vrot.slane %v602_v26, %v4087_v53  ;;  %v625_v31 = vrot.slane %v617_v18, %v4087_v53  ;;  %v632_v32 = vrot.slane %v618_v27, %v4087_v53 }
 0x3e6   : > { %v1246_v34 = vmul.f32 1.442695, %v1236_v28  ;;  %v1221_v35 = vpop.xlane.xlu0 %1220  ;;  %v1252_v25 = vmul.f32 1.442695, %v1239_v22 }
 0x3e7   : > { %v637_v36 = vcombine.low %v609_v29, %v616_v30  ;;  %v3325_v37 = vcombine.high %v609_v29, %v616_v30  ;;  %v653_v39 = vcombine.low %v625_v31, %v632_v32  ;;  %v3326_v40 = vcombine.high %v625_v31, %v632_v32 }
 0x3e8   : > { %v1237_v41 = vsub.f32 %v4144_v43, %v1221_v35  ;;  %3638 = vpow2.f32 %v1246_v34  ;;  %v4207_v62 = vpop.eup %3634 }
 0x3e9   : > { %v644_v42 = vrot.slane %v637_v36, %v4077_v33  ;;  %v652_v38 = vrot.slane %v3325_v37, %v4077_v33  ;;  %v660_v44 = vrot.slane %v653_v39, %v4077_v33  ;;  %v668_v45 = vrot.slane %v3326_v40, %v4077_v33  ;;  %v4209_v1 = vpop.eup %3636 }
 0x3ea   : > { %v1248_v46 = vmul.f32 1.442695, %v1237_v41  ;;  %v1282_v8 = vpack.c.bf16 %v4207_v62, %v4209_v1  ;;  %v2103_v18 = vpop.permute.xlu0 %2102 }
 0x3eb   : > { %v669_v49 = vcombine.low %v644_v42, %v652_v38  ;;  %v685_v50 = vcombine.low %v660_v44, %v668_v45  ;;  %v670_v54 = vcombine.high %v644_v42, %v652_v38  ;;  %v686_v55 = vcombine.high %v660_v44, %v668_v45 }
 0x3ec   : > { %3640 = vpow2.f32 %v1248_v46 }
 0x3ed   : > { %v677_v56 = vrot.slane %v669_v49, %v4087_v53  ;;  %v693_v57 = vrot.slane %v685_v50, %v4087_v53  ;;  %v684_v43 = vrot.slane %v670_v54, %v4087_v53  ;;  %v700_v58 = vrot.slane %v686_v55, %v4087_v53 }
 0x3ee   : > { %v2113_v29 = vpop.permute.xlu0 %2112 }
 0x3ef   : > { %v701_v59 = vcombine.low %v677_v56, %v693_v57  ;;  %v702_v60 = vcombine.high %v677_v56, %v693_v57  ;;  %v703_v61 = vcombine.low %v684_v43, %v700_v58  ;;  %v704_v5 = vcombine.high %v684_v43, %v700_v58 }
 0x3f1   : > { %v1286_v63 = vpack.c.bf16 %v701_v59, %v701_v59  ;;  %v1287_v0 = vpack.c.bf16 %v702_v60, %v702_v60  ;;  %v1288_v4 = vpack.c.bf16 %v703_v61, %v703_v61  ;;  %v1289_v17 = vpack.c.bf16 %v704_v5, %v704_v5 }
 0x3f3   : > { %v1295_v2 = vsel %vm1293_vm4, %v1286_v63, 0  ;;  %v1342_v3 = vsel %vm1293_vm4, %v1287_v0, 0  ;;  %v1389_v14 = vsel %vm1293_vm4, %v1288_v4, 0  ;;  %v1436_v21 = vsel %vm1293_vm4, %v1289_v17, 0 }
 0x3f4   : > { %3471 = vmatpush3.bf16.msra.mxu1 %v1295_v2  ;;  %3477 = vmatpush3.bf16.msra.mxu0 %v1342_v3 }
 0x3f5   : > { %3482 = vmatprep.subr.bf16.mxu1 %v3853_v6  ;;  %3488 = vmatprep.subr.bf16.mxu0 %v3853_v6  ;;  %v4217_v13 = vpop.eup %3638 }
 0x3f7   : > { %3473 = vmatmul.mubr.msk.bf16.vlgmr.msra.gmra.mxu1 %vm1021_vm3, %v1282_v8 }
 0x3f8   : > { %3483 = vmatpush3.bf16.msra.mxu1 %v1389_v14  ;;  %3484 = vmatprep.mubr.msk.bf16.mxu1 %vm3854_vm1, %v3853_v6 }
 0x3f9   : > { %v4223_v19 = vpop.eup %3640  ;;  %3494 = vmatprep.subr.bf16.mxu1 %v3853_v6 }
 0x3fa   : > { %v1283_v20 = vpack.c.bf16 %v4223_v19, %v4217_v13 }
 0x3fc   : > { %3479 = vmatmul.mubr.msk.bf16.vlgmr.msra.gmra.mxu0 %vm1021_vm3, %v1283_v20 }
 0x3fd   : > { %3489 = vmatpush3.bf16.msra.mxu0 %v1436_v21  ;;  %3490 = vmatprep.mubr.msk.bf16.mxu0 %vm3854_vm1, %v3853_v6 }
 0x3fe   : > { %3500 = vmatprep.subr.bf16.mxu0 %v3853_v6 }
 0x40f   : > { %v1224_v23 = vpop.xlane.xlu1 %1223 }
 0x410   : > { %v1238_v24 = vsub.f32 %v4147_v47, %v1224_v23 }
 0x412   : > { %v1250_v26 = vmul.f32 1.442695, %v1238_v24 }
 0x413   : > { %v1230_v27 = vpop.xlane.xlu1 %1229 }
 0x414   : > { %3642 = vpow2.f32 %v1250_v26  ;;  %v1240_v32 = vsub.f32 %v4149_v48, %v1230_v27 }
 0x415   : > { %3644 = vpow2.f32 %v1252_v25 }
 0x416   : > { %v1254_v39 = vmul.f32 1.442695, %v1240_v32 }
 0x417   : > { %v2101_v28 = vpop.permute.xlu1 %2100 }
 0x418   : > { %v2134_v30 = vcombine.low %v2101_v28, %v2113_v29  ;;  %v2135_v31 = vcombine.high %v2101_v28, %v2113_v29  ;;  %3646 = vpow2.f32 %v1254_v39 }
 0x41a   : > { %v2142_v12 = vrot.slane %v2134_v30, %v4077_v33  ;;  %v2149_v47 = vrot.slane %v2135_v31, %v4077_v33 }
 0x41b   : > { %v2107_v34 = vpop.permute.xlu1 %2106 }
 0x41c   : > { %v2118_v35 = vcombine.low %v4052_v10, %v2107_v34  ;;  %v2119_v51 = vcombine.high %v4052_v10, %v2107_v34 }
 0x41e   : > { %v2126_v36 = vrot.slane %v2118_v35, %v4077_v33  ;;  %v2133_v37 = vrot.slane %v2119_v51, %v4077_v33 }
 0x41f   : > { %v2109_v40 = vpop.permute.xlu1 %2108  ;;  %v1233_v41 = vpop.xlane.xlu0 %1232 }
 0x420   : > { %v2150_v42 = vcombine.low %v2126_v36, %v2142_v12  ;;  %v2151_v38 = vcombine.high %v2126_v36, %v2142_v12  ;;  %v2166_v44 = vcombine.low %v2133_v37, %v2149_v47  ;;  %v2167_v48 = vcombine.high %v2133_v37, %v2149_v47 }
 0x421   : > { %v4243_v45 = vpop.eup %3642  ;;  %v2186_v46 = vcombine.low %v4058_v15, %v2109_v40  ;;  %v1241_v10 = vsub.f32 %v4153_v52, %v1233_v41  ;;  %v2187_v57 = vcombine.high %v4058_v15, %v2109_v40 }
 0x422   : > { %v4247_v49 = vpop.eup %3644  ;;  %v2158_v50 = vrot.slane %v2150_v42, %v4087_v53  ;;  %v2165_v54 = vrot.slane %v2151_v38, %v4087_v53  ;;  %v2174_v55 = vrot.slane %v2166_v44, %v4087_v53  ;;  %v2181_v56 = vrot.slane %v2167_v48, %v4087_v53 }
 0x423   : > { %v1256_v43 = vmul.f32 1.442695, %v1241_v10  ;;  %v2115_v58 = vpop.permute.xlu1 %2114  ;;  %v1284_v59 = vpack.c.bf16 %v4247_v49, %v4243_v45  ;;  %v2194_v0 = vrot.slane %v2186_v46, %v4077_v33  ;;  %v2201_v14 = vrot.slane %v2187_v57, %v4077_v33 }
 0x424   : > { %v2254_v60 = vcombine.low %v2158_v50, %v2165_v54  ;;  %v3350_v52 = vcombine.high %v2158_v50, %v2165_v54  ;;  %v2270_v61 = vcombine.low %v2174_v55, %v2181_v56  ;;  %v3351_v63 = vcombine.high %v2174_v55, %v2181_v56 }
 0x425   : > { %3648 = vpow2.f32 %v1256_v43  ;;  %v2202_v2 = vcombine.low %v2103_v18, %v2115_v58  ;;  %v2203_v3 = vcombine.high %v2103_v18, %v2115_v58  ;;  %3485 = vmatmul.mubr.msk.bf16.vlgmr.msra.gmra.mxu1 %vm1021_vm3, %v1284_v59  ;;  %v4285_v37 = vpop.eup %3646 }
 0x426   : > { %v2261_v4 = vrot.slane %v2254_v60, %v4077_v33  ;;  %v2269_v15 = vrot.slane %v3350_v52, %v4077_v33  ;;  %v2277_v5 = vrot.slane %v2270_v61, %v4077_v33  ;;  %v2285_v8 = vrot.slane %v3351_v63, %v4077_v33  ;;  %3495 = vmatpush3.bf16.msra.mxu1 %v402_v11 }
 0x427   : > { %v2210_v17 = vrot.slane %v2202_v2, %v4077_v33  ;;  %v2217_v20 = vrot.slane %v2203_v3, %v4077_v33  ;;  %3496 = vmatprep.mubr.msk.bf16.mxu1 %vm3854_vm1, %v3853_v6  ;;  %3506 = vmatprep.subr.bf16.mxu1 %v3853_v6 }
 0x428   : > { %v2286_v25 = vcombine.low %v2261_v4, %v2269_v15  ;;  %v2302_v26 = vcombine.low %v2277_v5, %v2285_v8  ;;  %v2287_v27 = vcombine.high %v2261_v4, %v2269_v15  ;;  %v2303_v28 = vcombine.high %v2277_v5, %v2285_v8 }
 0x429   : > { %v2218_v21 = vcombine.low %v2194_v0, %v2210_v17  ;;  %v2219_v22 = vcombine.high %v2194_v0, %v2210_v17  ;;  %v2234_v23 = vcombine.low %v2201_v14, %v2217_v20  ;;  %v2235_v24 = vcombine.high %v2201_v14, %v2217_v20 }
 0x42a   : > { %v2294_v34 = vrot.slane %v2286_v25, %v4087_v53  ;;  %v2310_v35 = vrot.slane %v2302_v26, %v4087_v53  ;;  %v2301_v39 = vrot.slane %v2287_v27, %v4087_v53 }
 0x42b   : > { %v2226_v7 = vrot.slane %v2218_v21, %v4087_v53  ;;  %v2233_v9 = vrot.slane %v2219_v22, %v4087_v53  ;;  %v2242_v11 = vrot.slane %v2234_v23, %v4087_v53  ;;  %v2249_v18 = vrot.slane %v2235_v24, %v4087_v53 }
 0x42c   : > { %v2318_v48 = vcombine.low %v2294_v34, %v2310_v35  ;;  %v2319_v56 = vcombine.high %v2294_v34, %v2310_v35 }
 0x42d   : > { %v2322_v29 = vcombine.low %v2226_v7, %v2233_v9  ;;  %v3352_v30 = vcombine.high %v2226_v7, %v2233_v9  ;;  %v2338_v31 = vcombine.low %v2242_v11, %v2249_v18  ;;  %v3353_v32 = vcombine.high %v2242_v11, %v2249_v18  ;;  %3497 = vmatmul.mubr.msk.bf16.vlgmr.msra.gmra.mxu1 %vm403_vm2, %v4063_v16 }
 0x42e   : > { %3508 = vmatprep.mubr.msk.bf16.mxu1 %vm3854_vm1, %v3853_v6  ;;  %v2317_v16 = vrot.slane %v2303_v28, %v4087_v53 }
 0x42f   : > { %v2329_v51 = vrot.slane %v2322_v29, %v4077_v33  ;;  %v2337_v12 = vrot.slane %v3352_v30, %v4077_v33  ;;  %v2345_v47 = vrot.slane %v2338_v31, %v4077_v33  ;;  %v2353_v36 = vrot.slane %v3353_v32, %v4077_v33 }
 0x430   : > { %v2320_v57 = vcombine.low %v2301_v39, %v2317_v16  ;;  %v2321_v43 = vcombine.high %v2301_v39, %v2317_v16 }
 0x431   : > { %v2354_v40 = vcombine.low %v2329_v51, %v2337_v12  ;;  %v2355_v41 = vcombine.high %v2329_v51, %v2337_v12  ;;  %v2370_v42 = vcombine.low %v2345_v47, %v2353_v36  ;;  %v2371_v38 = vcombine.high %v2345_v47, %v2353_v36 }
 0x432   : > { %v4289_v44 = vpop.eup %3648 }
 0x433   : > { %v2362_v46 = vrot.slane %v2354_v40, %v4087_v53  ;;  %v2369_v10 = vrot.slane %v2355_v41, %v4087_v53  ;;  %v2378_v50 = vrot.slane %v2370_v42, %v4087_v53  ;;  %v2385_v54 = vrot.slane %v2371_v38, %v4087_v53 }
 0x434   : > { %v1285_v55 = vpack.c.bf16 %v4289_v44, %v4285_v37 }
 0x435   : > { %v2386_v58 = vcombine.low %v2362_v46, %v2378_v50  ;;  %v2387_v59 = vcombine.high %v2362_v46, %v2378_v50  ;;  %v2388_v60 = vcombine.low %v2369_v10, %v2385_v54  ;;  %v2389_v52 = vcombine.high %v2369_v10, %v2385_v54 }
 0x436   : > { %3491 = vmatmul.mubr.msk.bf16.vlgmr.msra.gmra.mxu0 %vm1021_vm3, %v1285_v55 }
 0x437   : > { %3502 = vmatprep.mubr.msk.bf16.mxu0 %vm3854_vm1, %v3853_v6  ;;  %v2390_v61 = vpack.c.bf16 %v2386_v58, %v2318_v48  ;;  %v2391_v63 = vpack.c.bf16 %v2387_v59, %v2319_v56  ;;  %v4300_v0 = vpack.c.bf16 %v2388_v60, %v2320_v57  ;;  %v4302_v2 = vpack.c.bf16 %v2389_v52, %v2321_v43 }
 0x4b7   : > { %v4304_v3 = vpop.f32.mrf.mxu1 }
 0x4b9   : > { %v3474_v4 = vpop.f32.mrf.mxu1 }
 0x4bb   : > { %v4306_v15 = vpop.f32.mrf.mxu1 }
 0x4bc   : > { %v4308_v5 = vpop.f32.mrf.mxu0 }
 0x4bd   : > { %v3475_v8 = vpop.f32.mrf.mxu1 }
 0x4be   : > { %v3480_v14 = vpop.f32.mrf.mxu0 }
 0x4c0   : > { %v4310_v17 = vpop.f32.mrf.mxu0 }
 0x4c2   : > { %v3481_v20 = vpop.f32.mrf.mxu0 }
 0x4e5   : > { %v4312_v21 = vpop.f32.mrf.mxu1 }
 0x4e7   : > { %v3486_v22 = vpop.f32.mrf.mxu1 }
 0x4e9   : > { %v4314_v23 = vpop.f32.mrf.mxu1 }
 0x4eb   : > { %v3487_v24 = vpop.f32.mrf.mxu1 }
 0x4ed   : > { %v4316_v25 = vpop.f32.mrf.mxu1 }
 0x4ee   : > { %1953 = vrot.lane.b32.xlu1 %v4316_v25, %s3856_s23  ;;  %1840 = vxpose.xlu0.b32.start.end [1/1] (short) (narrow) %v4316_v25, 32 }
 0x4ef   : > { %v3498_v26 = vpop.f32.mrf.mxu1 }
 0x4f1   : > { %v1837_v7 = vpop.f32.mrf.mxu1 }
 0x4f2   : > { %1956 = vrot.lane.b32.xlu1 %v4316_v25, %s3855_s21  ;;  %s3863_s21 = smov [#allocation8]  }
 0x4f3   : > { %v3499_v9 = vpop.f32.mrf.mxu1  ;;  %s3782_s23 = sshll.u32 %s3863_s21, 4  ;;  %s3783_s23 = int_to_ptr.vmem [resolvable:$false] %s3782_s23 }
 0x4f4   : > { %s3784_s30 = scalar_lea.vmem %s3783_s23, 1024  ;;  %p3785_p13 = scmp.lt.s32.totalorder %s4577_s28, %s3783_s23 }
 0x4f5   : > { %p3786_p0 = scmp.lt.s32.totalorder %s3784_s30, %s3778_s26 }
 0x4f6   : > { %v4323_v11 = vpop.f32.mrf.mxu0 }
 0x4f7   : > { %p3787_p10 = por %p3786_p0, %p3785_p13 }
 0x4f8   : > { %v3492_v18 = vpop.f32.mrf.mxu0 }
 0x4f9   : > { %p3788_p3 = pnand %p3787_p10, %p3781_p12 }
 0x4fa   : > { %v4325_v27 = vpop.f32.mrf.mxu0 }
 0x4fc   : > { %v3493_v28 = vpop.f32.mrf.mxu0 }
 0x56a   : > { %v1856_v29 = vpop.trf.xlu0 }
 0x56e   : > { %v1857_v30 = vpop.trf.xlu0 }
 0x56f   : > { %v1884_v31 = vcombine.low %v1856_v29, %v1857_v30  ;;  %v3346_v32 = vcombine.high %v1856_v29, %v1857_v30 }
 0x571   : > { %v1891_v35 = vrot.slane %v1884_v31, %v4077_v33  ;;  %v1899_v51 = vrot.slane %v3346_v32, %v4077_v33 }
 0x572   : > { %v1858_v34 = vpop.trf.xlu0 }
 0x573   : > { %v1900_v39 = vcombine.low %v1891_v35, %v1899_v51  ;;  %v1901_v38 = vcombine.high %v1891_v35, %v1899_v51 }
 0x575   : > { %v1908_v48 = vrot.slane %v1900_v39, %v4087_v53  ;;  %v1915_v55 = vrot.slane %v1901_v38, %v4087_v53  ;;  %v1279_v38 = vsel %vm1021_vm3, %v4289_v44, 0.0 }
 0x576   : > { %v1859_v12 = vpop.trf.xlu0 }
 0x577   : > { %v1918_v47 = vcombine.low %v1858_v34, %v1859_v12  ;;  %v3347_v36 = vcombine.high %v1858_v34, %v1859_v12 }
 0x579   : > { %v1925_v16 = vrot.slane %v1918_v47, %v4077_v33  ;;  %v1933_v40 = vrot.slane %v3347_v36, %v4077_v33 }
 0x57b   : > { %v1934_v41 = vcombine.low %v1925_v16, %v1933_v40  ;;  %v1935_v42 = vcombine.high %v1925_v16, %v1933_v40  ;;  %v1258_v16 = vsel %vm1021_vm3, %v4209_v1, 0.0  ;;  %v1261_v40 = vsel %vm1021_vm3, %v4207_v62, 0.0 }
 0x57c   : > { %v1264_v62 = vsel %vm1021_vm3, %v4217_v13, 0.0 }
 0x57d   : > { %v1942_v46 = vrot.slane %v1934_v41, %v4087_v53  ;;  %v1949_v10 = vrot.slane %v1935_v42, %v4087_v53  ;;  %v1267_v41 = vsel %vm1021_vm3, %v4223_v19, 0.0  ;;  %v1273_v42 = vsel %vm1021_vm3, %v4247_v49, 0.0 }
 0x57e   : > { %v1270_v19 = vsel %vm1021_vm3, %v4243_v45, 0.0  ;;  %v1276_v49 = vsel %vm1021_vm3, %v4285_v37, 0.0 }
 0x57f   : > { %v2402_v50 = vcombine.low %v1908_v48, %v1942_v46  ;;  %v3354_v54 = vcombine.high %v1908_v48, %v1942_v46  ;;  %v2404_v59 = vcombine.low %v1915_v55, %v1949_v10  ;;  %v3355_v60 = vcombine.high %v1915_v55, %v1949_v10  ;;  %v1954_v48 = vpop.permute.xlu1 %1953 }
 0x581   : > { %v2410_v56 = vpack.c.bf16 %v2402_v50, %v2402_v50  ;;  %v2411_v57 = vpack.c.bf16 %v3354_v54, %v3354_v54  ;;  %v2412_v52 = vpack.c.bf16 %v2404_v59, %v2404_v59  ;;  %v2413_v4 = vpack.c.bf16 %v3355_v60, %v3355_v60 }
 0x583   : > { %v2418_v43 = vsel %vm1021_vm3, %v2410_v56, 0  ;;  %v2465_v58 = vsel %vm1021_vm3, %v2411_v57, 0  ;;  %v2512_v8 = vsel %vm1021_vm3, %v2412_v52, 0  ;;  %v2559_v14 = vsel %vm1021_vm3, %v2413_v4, 0  ;;  %v1957_v46 = vpop.permute.xlu1 %1956 }
 0x584   : > { %3501 = vmatpush3.bf16.xpose.msra.mxu0 %v2418_v43  ;;  %3507 = vmatpush3.bf16.xpose.msra.mxu1 %v2465_v58  ;;  %v1962_v60 = vcombine.low %v4316_v25, %v1957_v46  ;;  %v1963_v37 = vcombine.high %v4316_v25, %v1957_v46 }
 0x585   : > { %3512 = vmatprep.subr.bf16.mxu0 %v3853_v6  ;;  %3518 = vmatprep.subr.bf16.mxu1 %v3853_v6 }
 0x58b   : > { %3503 = vmatmul.mubr.msk.bf16.vlgmr.msra.gmra.mxu0 %vm1021_vm3, %v2390_v61  ;;  %3509 = vmatmul.mubr.msk.bf16.vlgmr.msra.gmra.mxu1 %vm1021_vm3, %v2391_v63 }
 0x58c   : > { %3513 = vmatpush3.bf16.xpose.msra.mxu0 %v2512_v8  ;;  %3519 = vmatpush3.bf16.xpose.msra.mxu1 %v2559_v14 }
 0x58d   : > { %3514 = vmatprep.mubr.msk.bf16.mxu0 %vm3854_vm1, %v3853_v6  ;;  %3520 = vmatprep.mubr.msk.bf16.mxu1 %vm3854_vm1, %v3853_v6 }
 0x58e   : > { %3524 = vmatprep.subr.bf16.mxu0 %v3853_v6  ;;  %3530 = vmatprep.subr.bf16.mxu1 %v3853_v6 }
 0x593   : > { %3515 = vmatmul.mubr.msk.bf16.vlgmr.msra.gmra.mxu0 %vm1021_vm3, %v4300_v0  ;;  %3521 = vmatmul.mubr.msk.bf16.vlgmr.msra.gmra.mxu1 %vm1021_vm3, %v4302_v2 }
 0x594   : > { %3526 = vmatprep.mubr.msk.bf16.mxu0 %vm3854_vm1, %v3853_v6  ;;  %3532 = vmatprep.mubr.msk.bf16.mxu1 %vm3854_vm1, %v3853_v6 }
 0x64b   : > { %v2454_v61 = vpop.f32.mrf.mxu0  ;;  %v2501_v63 = vpop.f32.mrf.mxu1 }
 0x64c   : > { %v2602_v20 = vsel %vm1021_vm3, %v2454_v61, -inf  ;;  %v2608_v0 = vsel %vm1021_vm3, %v2501_v63, -inf }
 0x64d   : > { %v3510_v22 = vpop.f32.mrf.mxu1  ;;  %2603 = vmax.xlane.f32.xlu1 %v2602_v20  ;;  %v3504_v24 = vpop.f32.mrf.mxu0 }
 0x64e   : > { %v1977_v22 = vrot.slane %v1963_v37, %v4077_v33 }
 0x64f   : > { %v2457_v26 = vpop.f32.mrf.mxu0  ;;  %v2504_v7 = vpop.f32.mrf.mxu1 }
 0x650   : > { %v2605_v9 = vsel %vm1021_vm3, %v2457_v26, -inf  ;;  %v2611_v30 = vsel %vm1021_vm3, %v2504_v7, -inf }
 0x651   : > { %v3511_v2 = vpop.f32.mrf.mxu1  ;;  %2609 = vmax.xlane.f32.xlu1 %v2608_v0  ;;  %2606 = vmax.xlane.f32.xlu0 %v2605_v9  ;;  %v3505_v18 = vpop.f32.mrf.mxu0 }
 0x653   : > { %v4360_v28 = vpop.f32.mrf.mxu0  ;;  %v4362_v29 = vpop.f32.mrf.mxu1 }
 0x654   : > { %v2620_v31 = vsel %vm1021_vm3, %v4362_v29, -inf  ;;  %v2614_v1 = vsel %vm1021_vm3, %v4360_v28, -inf }
 0x655   : > { %v3522_v32 = vpop.f32.mrf.mxu1  ;;  %2612 = vmax.xlane.f32.xlu1 %v2611_v30  ;;  %2621 = vmax.xlane.f32.xlu0 %v2620_v31  ;;  %v3516_v34 = vpop.f32.mrf.mxu0 }
 0x657   : > { %v2551_v35 = vpop.f32.mrf.mxu0  ;;  %v4367_v51 = vpop.f32.mrf.mxu1 }
 0x658   : > { %v2617_v12 = vsel %vm1021_vm3, %v2551_v35, -inf  ;;  %v2623_v39 = vsel %vm1021_vm3, %v4367_v51, -inf }
 0x659   : > { %v3523_v47 = vpop.f32.mrf.mxu1  ;;  %2618 = vmax.xlane.f32.xlu0 %v2617_v12  ;;  %v3517_v36 = vpop.f32.mrf.mxu0 }
 0x65d   : > { %2624 = vmax.xlane.f32.xlu0 %v2623_v39 }
 0x661   : > { %1259 = vadd.xlane.f32.xlu0 %v1258_v16 }
 0x665   : > { %1262 = vadd.xlane.f32.xlu0 %v1261_v40 }
 0x666   : > { %1959 = vrot.lane.b32.xlu1 %v4316_v25, %s3857_s29 }
 0x669   : > { %1268 = vadd.xlane.f32.xlu0 %v1267_v41 }
 0x66d   : > { %1274 = vadd.xlane.f32.xlu0 %v1273_v42 }
 0x671   : > { %1280 = vadd.xlane.f32.xlu0 %v1279_v38 }
 0x68a   : > { %2615 = vmax.xlane.f32.xlu1 %v2614_v1 }
 0x68e   : > { %1265 = vadd.xlane.f32.xlu1 %v1264_v62 }
 0x692   : > { %1271 = vadd.xlane.f32.xlu1 %v1270_v19 }
 0x696   : > { %1277 = vadd.xlane.f32.xlu1 %v1276_v49 }
 0x6d6   : > { %v2604_v44 = vpop.xlane.xlu1 %2603 }
 0x6d7   : > { %v2626_v10 = vsub.f32 %v2454_v61, %v2604_v44 }
 0x6d9   : > { %v2634_v50 = vmul.f32 1.442695, %v2626_v10 }
 0x6da   : > { %v2610_v54 = vpop.xlane.xlu1 %2609  ;;  %v2607_v55 = vpop.xlane.xlu0 %2606 }
 0x6db   : > { %3650 = vpow2.f32 %v2634_v50  ;;  %v2628_v56 = vsub.f32 %v2501_v63, %v2610_v54  ;;  %v2627_v57 = vsub.f32 %v2457_v26, %v2607_v55  ;;  %v1970_v63 = vrot.slane %v1962_v60, %v4077_v33 }
 0x6dd   : > { %v2638_v13 = vmul.f32 1.442695, %v2628_v56  ;;  %v2636_v43 = vmul.f32 1.442695, %v2627_v57 }
 0x6de   : > { %v2613_v58 = vpop.xlane.xlu1 %2612  ;;  %v2622_v59 = vpop.xlane.xlu0 %2621 }
 0x6df   : > { %3652 = vpow2.f32 %v2638_v13  ;;  %v2629_v45 = vsub.f32 %v2504_v7, %v2613_v58  ;;  %v2632_v38 = vsub.f32 %v4362_v29, %v2622_v59 }
 0x6e0   : > { %3654 = vpow2.f32 %v2636_v43 }
 0x6e1   : > { %v2640_v52 = vmul.f32 1.442695, %v2629_v45  ;;  %v2646_v56 = vmul.f32 1.442695, %v2632_v38 }
 0x6e2   : > { %v1960_v4 = vpop.permute.xlu1 %1959  ;;  %v2619_v8 = vpop.xlane.xlu0 %2618 }
 0x6e3   : > { %3656 = vpow2.f32 %v2640_v52  ;;  %v1978_v14 = vcombine.low %v1954_v48, %v1960_v4  ;;  %v1979_v61 = vcombine.high %v1954_v48, %v1960_v4  ;;  %v2631_v20 = vsub.f32 %v2551_v35, %v2619_v8 }
 0x6e5   : > { %v1986_v24 = vrot.slane %v1978_v14, %v4077_v33  ;;  %v1993_v26 = vrot.slane %v1979_v61, %v4077_v33  ;;  %v2644_v7 = vmul.f32 1.442695, %v2631_v20 }
 0x6e6   : > { %v2625_v0 = vpop.xlane.xlu0 %2624 }
 0x6e7   : > { %v1994_v9 = vcombine.low %v1970_v63, %v1986_v24  ;;  %v1995_v2 = vcombine.high %v1970_v63, %v1986_v24  ;;  %v2010_v25 = vcombine.low %v1977_v22, %v1993_v26  ;;  %v2011_v18 = vcombine.high %v1977_v22, %v1993_v26 }
 0x6e8   : > { %v4398_v30 = vpop.eup %3650  ;;  %3658 = vpow2.f32 %v2644_v7  ;;  %v2633_v31 = vsub.f32 %v4367_v51, %v2625_v0 }
 0x6e9   : > { %v2002_v32 = vrot.slane %v1994_v9, %v4087_v53  ;;  %v2009_v34 = vrot.slane %v1995_v2, %v4087_v53  ;;  %v2018_v35 = vrot.slane %v2010_v25, %v4087_v53  ;;  %v2025_v12 = vrot.slane %v2011_v18, %v4087_v53 }
 0x6ea   : > { %v2648_v47 = vmul.f32 1.442695, %v2633_v31  ;;  %v2650_v36 = vsel %vm1021_vm3, %v4398_v30, 0.0  ;;  %v4407_v39 = vpop.xlane.xlu0 %1259 }
 0x6eb   : > { %v2030_v16 = vcombine.low %v2002_v32, %v2009_v34  ;;  %v3348_v40 = vcombine.high %v2002_v32, %v2009_v34  ;;  %v2046_v41 = vcombine.low %v2018_v35, %v2025_v12  ;;  %v3349_v42 = vcombine.high %v2018_v35, %v2025_v12  ;;  %2651 = vadd.xlane.f32.xlu1 %v2650_v36 }
 0x6ec   : > { %v3653_v51 = vpop.eup %3652  ;;  %3660 = vpow2.f32 %v2648_v47 }
 0x6ed   : > { %v3655_v1 = vpop.eup %3654  ;;  %v2037_v62 = vrot.slane %v2030_v16, %v4077_v33  ;;  %v2045_v19 = vrot.slane %v3348_v40, %v4077_v33  ;;  %v2053_v49 = vrot.slane %v2046_v41, %v4077_v33  ;;  %v2061_v48 = vrot.slane %v3349_v42, %v4077_v33 }
 0x6ee   : > { %v2656_v46 = vsel %vm1021_vm3, %v3653_v51, 0.0  ;;  %v2653_v44 = vsel %vm1021_vm3, %v3655_v1, 0.0  ;;  %v1263_v10 = vpop.xlane.xlu0 %1262  ;;  %3662 = vpow2.f32 %v2646_v56  ;;  %v2674_v2 = vpack.c.bf16 %v3655_v1, %v4398_v30 }
 0x6ef   : > { %2657 = vadd.xlane.f32.xlu1 %v2656_v46  ;;  %2654 = vadd.xlane.f32.xlu0 %v2653_v44  ;;  %v2062_v50 = vcombine.low %v2037_v62, %v2045_v19  ;;  %v2078_v54 = vcombine.low %v2053_v49, %v2061_v48  ;;  %v2063_v29 = vcombine.high %v2037_v62, %v2045_v19  ;;  %3664 = vrcp.f32 %v1263_v10 }
 0x6f0   : > { %v3657_v55 = vpop.eup %3656  ;;  %v2079_v57 = vcombine.high %v2053_v49, %v2061_v48 }
 0x6f1   : > { %v2659_v13 = vsel %vm1021_vm3, %v3657_v55, 0.0  ;;  %v2070_v43 = vrot.slane %v2062_v50, %v4087_v53  ;;  %v2086_v58 = vrot.slane %v2078_v54, %v4087_v53  ;;  %v2077_v45 = vrot.slane %v2063_v29, %v4087_v53 }
 0x6f2   : > { %v1269_v59 = vpop.xlane.xlu0 %1268  ;;  %v2093_v60 = vrot.slane %v2079_v57, %v4087_v53  ;;  %v2675_v31 = vpack.c.bf16 %v3657_v55, %v3653_v51 }
 0x6f3   : > { %2660 = vadd.xlane.f32.xlu0 %v2659_v13  ;;  %v2094_v37 = vcombine.low %v2070_v43, %v2086_v58  ;;  %v2095_v52 = vcombine.high %v2070_v43, %v2086_v58 }
 0x6f4   : > { %v2096_v4 = vcombine.low %v2077_v45, %v2093_v60  ;;  %v2097_v8 = vcombine.high %v2077_v45, %v2093_v60 }
 0x6f5   : > { %v4421_v14 = vpop.eup %3658  ;;  %v2678_v61 = vpack.c.bf16 %v2094_v37, %v2094_v37  ;;  %v2679_v20 = vpack.c.bf16 %v2095_v52, %v2095_v52 }
 0x6f6   : > { %v2665_v63 = vsel %vm1021_vm3, %v4421_v14, 0.0  ;;  %v1275_v22 = vpop.xlane.xlu0 %1274  ;;  %v2680_v7 = vpack.c.bf16 %v2096_v4, %v2096_v4  ;;  %v2681_v0 = vpack.c.bf16 %v2097_v8, %v2097_v8 }
 0x6f7   : > { %2666 = vadd.xlane.f32.xlu0 %v2665_v63  ;;  %3666 = vrcp.f32 %v1275_v22  ;;  %v2686_v24 = vsel %vm1293_vm4, %v2678_v61, 0  ;;  %v2733_v26 = vsel %vm1293_vm4, %v2679_v20, 0 }
 0x6f8   : > { %3525 = vmatpush3.bf16.msra.mxu0 %v2686_v24  ;;  %3531 = vmatpush3.bf16.msra.mxu1 %v2733_v26  ;;  %3668 = vrcp.f32 %v1269_v59  ;;  %v2780_v32 = vsel %vm1293_vm4, %v2680_v7, 0  ;;  %v2827_v34 = vsel %vm1293_vm4, %v2681_v0, 0 }
 0x6f9   : > { %v3661_v9 = vpop.eup %3660  ;;  %3536 = vmatprep.subr.bf16.mxu0 %v3853_v6  ;;  %3542 = vmatprep.subr.bf16.mxu1 %v3853_v6 }
 0x6fa   : > { %v2671_v25 = vsel %vm1021_vm3, %v3661_v9, 0.0  ;;  %v1281_v18 = vpop.xlane.xlu0 %1280 }
 0x6fb   : > { %2672 = vadd.xlane.f32.xlu0 %v2671_v25  ;;  %3670 = vrcp.f32 %v1281_v18  ;;  %3527 = vmatmul.mubr.msk.bf16.vlgmr.msra.gmra.mxu0 %vm1021_vm3, %v2674_v2  ;;  %v3663_v30 = vpop.eup %3662 }
 0x6fc   : > { %3533 = vmatmul.mubr.msk.bf16.vlgmr.msra.gmra.mxu1 %vm1021_vm3, %v2675_v31  ;;  %3537 = vmatpush3.bf16.msra.mxu0 %v2780_v32  ;;  %v2677_v35 = vpack.c.bf16 %v3661_v9, %v3663_v30  ;;  %v3665_v12 = vpop.eup %3664  ;;  %v2668_v25 = vsel %vm1021_vm3, %v3663_v30, 0.0 }
 0x6fd   : > { %3543 = vmatpush3.bf16.msra.mxu1 %v2827_v34  ;;  %3544 = vmatprep.mubr.msk.bf16.mxu1 %vm3854_vm1, %v3853_v6  ;;  %v1488_v40 = vmul.f32 %v3665_v12, %v4306_v15 }
 0x6fe   : > { %3538 = vmatprep.mubr.msk.bf16.mxu0 %vm3854_vm1, %v3853_v6 }
 0x704   : > { %v3667_v47 = vpop.eup %3666  ;;  %3545 = vmatmul.mubr.msk.bf16.vlgmr.msra.gmra.mxu1 %vm1021_vm3, %v2677_v35 }
 0x705   : > { %v1492_v36 = vmul.f32 %v3667_v47, %v4314_v23  ;;  %v3669_v16 = vpop.eup %3668 }
 0x706   : > { %v1490_v42 = vmul.f32 %v3669_v16, %v4310_v17 }
 0x707   : > { %v1563_v51 = vcombine.low %v1488_v40, %v1492_v36  ;;  %v1564_v38 = vcombine.high %v1488_v40, %v1492_v36 }
 0x708   : > { %v3671_v41 = vpop.eup %3670 }
 0x709   : > { %v1494_v1 = vmul.f32 %v3671_v41, %v4325_v27  ;;  %v1571_v19 = vrot.slane %v1563_v51, %v4077_v33  ;;  %v1578_v49 = vrot.slane %v1564_v38, %v4077_v33 }
 0x70b   : > { %v1579_v62 = vcombine.low %v1490_v42, %v1494_v1  ;;  %v1580_v6 = vcombine.high %v1490_v42, %v1494_v1 }
 0x70d   : > { %v1587_v48 = vrot.slane %v1579_v62, %v4077_v33  ;;  %v1594_v23 = vrot.slane %v1580_v6, %v4077_v33 }
 0x70f   : > { %v1595_v46 = vcombine.low %v1571_v19, %v1587_v48  ;;  %v1596_v44 = vcombine.high %v1571_v19, %v1587_v48  ;;  %v1611_v15 = vcombine.low %v1578_v49, %v1594_v23  ;;  %v1612_v10 = vcombine.high %v1578_v49, %v1594_v23 }
 0x711   : > { %v1603_v17 = vrot.slane %v1595_v46, %v4087_v53  ;;  %v1610_v50 = vrot.slane %v1596_v44, %v4087_v53  ;;  %v1619_v27 = vrot.slane %v1611_v15, %v4087_v53  ;;  %v1626_v54 = vrot.slane %v1612_v10, %v4087_v53 }
 0x713   : > { %v2616_v29 = vpop.xlane.xlu1 %2615  ;;  %v1699_v55 = vcombine.low %v1603_v17, %v1610_v50  ;;  %v3343_v56 = vcombine.high %v1603_v17, %v1610_v50  ;;  %v1715_v57 = vcombine.low %v1619_v27, %v1626_v54  ;;  %v3344_v13 = vcombine.high %v1619_v27, %v1626_v54 }
 0x714   : > { %v2630_v43 = vsub.f32 %v4360_v28, %v2616_v29 }
 0x715   : > { %v4454_v58 = vrot.slane %v1699_v55, %v4077_v33  ;;  %v4457_v59 = vrot.slane %v3343_v56, %v4077_v33  ;;  %v4460_v45 = vrot.slane %v1715_v57, %v4077_v33  ;;  %v4463_v60 = vrot.slane %v3344_v13, %v4077_v33 }
 0x716   : > { %v2642_v37 = vmul.f32 1.442695, %v2630_v43 }
 0x717   : > { %v1266_v52 = vpop.xlane.xlu1 %1265  ;;  %v1731_v4 = vcombine.low %v4454_v58, %v4457_v59  ;;  %v1747_v28 = vcombine.low %v4460_v45, %v4463_v60  ;;  %v1732_v15 = vcombine.high %v4454_v58, %v4457_v59  ;;  %v1748_v10 = vcombine.high %v4460_v45, %v4463_v60 }
 0x718   : > { %3672 = vpow2.f32 %v2642_v37 }
 0x719   : > { %v4470_v8 = vrot.slane %v1731_v4, %v4087_v53  ;;  %v4473_v61 = vrot.slane %v1747_v28, %v4087_v53  ;;  %3674 = vrcp.f32 %v4407_v39  ;;  %v1746_v13 = vrot.slane %v1732_v15, %v4087_v53 }
 0x71a   : > { %v1762_v58 = vrot.slane %v1748_v10, %v4087_v53 }
 0x71b   : > { %v1272_v20 = vpop.xlane.xlu1 %1271  ;;  %v1764_v63 = vcombine.high %v4470_v8, %v4473_v61  ;;  %v1763_v22 = vcombine.low %v4470_v8, %v4473_v61 }
 0x71c   : > { %3676 = vrcp.f32 %v1272_v20  ;;  %v1765_v45 = vcombine.low %v1746_v13, %v1762_v58 }
 0x71d   : > { %1771 = vrot.lane.b32.xlu0 %v1764_v63, %s3860_s7  ;;  %3678 = vrcp.f32 %v1266_v52  ;;  %v1766_v52 = vcombine.high %v1746_v13, %v1762_v58 }
 0x71f   : > { %v1278_v24 = vpop.xlane.xlu1 %1277 }
 0x720   : > { %3680 = vrcp.f32 %v1278_v24 }
 0x725   : > { %v3673_v26 = vpop.eup %3672 }
 0x726   : > { %v2662_v7 = vsel %vm1021_vm3, %v3673_v26, 0.0  ;;  %v2676_v0 = vpack.c.bf16 %v4421_v14, %v3673_v26  ;;  %v3675_v39 = vpop.eup %3674 }
 0x727   : > { %2663 = vadd.xlane.f32.xlu1 %v2662_v7  ;;  %v1487_v31 = vmul.f32 %v3675_v39, %v4304_v3 }
 0x728   : > { %3539 = vmatmul.mubr.msk.bf16.vlgmr.msra.gmra.mxu0 %vm1021_vm3, %v2676_v0 }
 0x729   : > { %v3677_v9 = vpop.eup %3676 }
 0x72a   : > { %v1491_v2 = vmul.f32 %v3677_v9, %v4312_v21  ;;  %v3679_v18 = vpop.eup %3678 }
 0x72b   : > { %2669 = vadd.xlane.f32.xlu1 %v2668_v25  ;;  %v1489_v34 = vmul.f32 %v3679_v18, %v4308_v5 }
 0x72c   : > { %v1495_v35 = vcombine.low %v1487_v31, %v1491_v2  ;;  %v1496_v12 = vcombine.high %v1487_v31, %v1491_v2 }
 0x72d   : > { %v3681_v32 = vpop.eup %3680 }
 0x72e   : > { %v1493_v14 = vmul.f32 %v3681_v32, %v4323_v11  ;;  %v1503_v16 = vrot.slane %v1495_v35, %v4077_v33  ;;  %v1510_v40 = vrot.slane %v1496_v12, %v4077_v33 }
 0x730   : > { %v1511_v47 = vcombine.low %v1489_v34, %v1493_v14  ;;  %v1512_v36 = vcombine.high %v1489_v34, %v1493_v14 }
 0x732   : > { %v1519_v21 = vrot.slane %v1511_v47, %v4077_v33  ;;  %v1526_v30 = vrot.slane %v1512_v36, %v4077_v33 }
 0x734   : > { %v1527_v41 = vcombine.low %v1503_v16, %v1519_v21  ;;  %v1528_v42 = vcombine.high %v1503_v16, %v1519_v21  ;;  %v1543_v3 = vcombine.low %v1510_v40, %v1526_v30  ;;  %v1544_v51 = vcombine.high %v1510_v40, %v1526_v30 }
 0x736   : > { %v1535_v5 = vrot.slane %v1527_v41, %v4087_v53  ;;  %v1542_v38 = vrot.slane %v1528_v42, %v4087_v53  ;;  %v1551_v11 = vrot.slane %v1543_v3, %v4087_v53  ;;  %v1558_v1 = vrot.slane %v1544_v51, %v4087_v53 }
 0x738   : > { %v1631_v62 = vcombine.low %v1535_v5, %v1542_v38  ;;  %v3341_v6 = vcombine.high %v1535_v5, %v1542_v38  ;;  %v1647_v19 = vcombine.low %v1551_v11, %v1558_v1  ;;  %v3342_v49 = vcombine.high %v1551_v11, %v1558_v1 }
 0x73a   : > { %v1638_v48 = vrot.slane %v1631_v62, %v4077_v33  ;;  %v1646_v23 = vrot.slane %v3341_v6, %v4077_v33  ;;  %v1654_v46 = vrot.slane %v1647_v19, %v4077_v33  ;;  %v1662_v44 = vrot.slane %v3342_v49, %v4077_v33 }
 0x73c   : > { %v1663_v17 = vcombine.low %v1638_v48, %v1646_v23  ;;  %v1679_v50 = vcombine.low %v1654_v46, %v1662_v44  ;;  %v1664_v27 = vcombine.high %v1638_v48, %v1646_v23  ;;  %v1680_v54 = vcombine.high %v1654_v46, %v1662_v44 }
 0x73e   : > { %v1671_v29 = vrot.slane %v1663_v17, %v4087_v53  ;;  %v1687_v55 = vrot.slane %v1679_v50, %v4087_v53  ;;  %v1678_v56 = vrot.slane %v1664_v27, %v4087_v53  ;;  %v1694_v57 = vrot.slane %v1680_v54, %v4087_v53 }
 0x740   : > { %v1696_v43 = vcombine.high %v1671_v29, %v1687_v55  ;;  %v1697_v37 = vcombine.low %v1678_v56, %v1694_v57  ;;  %v1695_v59 = vcombine.low %v1671_v29, %v1687_v55  ;;  %v1698_v60 = vcombine.high %v1678_v56, %v1694_v57 }
 0x742   : > { %1769 = vrot.lane.b32.xlu1 %v1696_v43, %s3860_s7  ;;  %1777 = vrot.lane.b32.xlu0 %v1697_v37, %s3861_s8 }
 0x746   : > { %1779 = vrot.lane.b32.xlu1 %v1765_v45, %s3861_s8  ;;  %1785 = vrot.lane.b32.xlu0 %v1698_v60, %s3862_s9 }
 0x74a   : > { %1787 = vrot.lane.b32.xlu1 %v1766_v52, %s3862_s9 }
 0x774   : > { %v2652_v20 = vpop.xlane.xlu1 %2651 }
 0x778   : > { %v2655_v4 = vpop.xlane.xlu0 %2654  ;;  %v2658_v24 = vpop.xlane.xlu1 %2657 }
 0x77c   : > { %v2661_v28 = vpop.xlane.xlu0 %2660 }
 0x780   : > { %v2667_v63 = vpop.xlane.xlu0 %2666 }
 0x784   : > { %v2673_v26 = vpop.xlane.xlu0 %2672 }
 0x78f   : > { %v1772_v7 = vpop.permute.xlu0 %1771 }
 0x790   : > { %v1792_v36 = vsel %vm1021_vm3, %v1763_v22, %v1772_v7 }
 0x7b0   : > { %v2664_v0 = vpop.xlane.xlu1 %2663 }
 0x7b4   : > { %v2670_v39 = vpop.xlane.xlu1 %2669  ;;  %v1778_v9 = vpop.permute.xlu0 %1777 }
 0x7b5   : > { %3682 = vrcp.f32 %v2670_v39 }
 0x7b6   : > { %3684 = vrcp.f32 %v2658_v24 }
 0x7b7   : > { %3686 = vrcp.f32 %v2652_v20 }
 0x7b8   : > { %v1770_v2 = vpop.permute.xlu1 %1769  ;;  %v1786_v31 = vpop.permute.xlu0 %1785  ;;  %3688 = vrcp.f32 %v2664_v0 }
 0x7b9   : > { %v1791_v25 = vsel %vm1021_vm3, %v1695_v59, %v1770_v2  ;;  %3690 = vrcp.f32 %v2673_v26 }
 0x7ba   : > { %v1793_v18 = vsel %vm403_vm2, %v1791_v25, %v1778_v9  ;;  %3692 = vrcp.f32 %v2661_v28 }
 0x7bb   : > { %v1796_v32 = vsel %vm1795_vm5, %v1793_v18, %v1786_v31  ;;  %v2722_v34 = vpop.f32.mrf.mxu0  ;;  %3694 = vrcp.f32 %v2667_v63 }
 0x7bc   : > { %1798 = vst.msk [vmem:[%s4520_s24] sm:$0xff] %vm284_vm0, %v1796_v32  ;;  %v2769_v35 = vpop.f32.mrf.mxu1  ;;  %v1780_v12 = vpop.permute.xlu1 %1779  ;;  %3696 = vrcp.f32 %v2655_v4 }
 0x7bd   : > { %v3528_v14 = vpop.f32.mrf.mxu0  ;;  %v1794_v40 = vsel %vm403_vm2, %v1792_v36, %v1780_v12 }
 0x7be   : > { %v3534_v47 = vpop.f32.mrf.mxu1 }
 0x7bf   : > { %v2725_v16 = vpop.f32.mrf.mxu0 }
 0x7c0   : > { %v2772_v21 = vpop.f32.mrf.mxu1  ;;  %v1788_v30 = vpop.permute.xlu1 %1787 }
 0x7c1   : > { %v1797_v41 = vsel %vm1795_vm5, %v1794_v40, %v1788_v30  ;;  %v3529_v42 = vpop.f32.mrf.mxu0 }
 0x7c2   : > { %1799 = vst.msk [vmem:[%s4520_s24 + $0x8] sm:$0xff] %vm284_vm0, %v1797_v41  ;;  %v3535_v3 = vpop.f32.mrf.mxu1  ;;  %v3683_v8 = vpop.eup %3682 }
 0x7c3   : > { %v3685_v22 = vpop.eup %3684 }
 0x7c4   : > { %v2863_v51 = vpop.f32.mrf.mxu1  ;;  %v2880_v1 = vmul.f32 %v3685_v22, %v2769_v35  ;;  %v3687_v62 = vpop.eup %3686 }
 0x7c5   : > { %v2884_v61 = vmul.f32 %v3683_v8, %v2863_v51  ;;  %v3689_v6 = vpop.eup %3688  ;;  %v2878_v23 = vmul.f32 %v3687_v62, %v2722_v34 }
 0x7c6   : > { %v3546_v5 = vpop.f32.mrf.mxu1  ;;  %v3691_v48 = vpop.eup %3690 }
 0x7c7   : > { %v2902_v19 = vcombine.low %v2880_v1, %v2884_v61  ;;  %v2903_v46 = vcombine.high %v2880_v1, %v2884_v61  ;;  %v3693_v17 = vpop.eup %3692 }
 0x7c8   : > { %v2866_v38 = vpop.f32.mrf.mxu1  ;;  %v3695_v54 = vpop.eup %3694  ;;  %v2881_v29 = vmul.f32 %v3693_v17, %v2772_v21 }
 0x7c9   : > { %v2885_v15 = vmul.f32 %v3691_v48, %v2866_v38  ;;  %v2910_v55 = vrot.slane %v2902_v19, %v4077_v33  ;;  %v3697_v57 = vpop.eup %3696  ;;  %v2917_v13 = vrot.slane %v2903_v46, %v4077_v33 }
 0x7ca   : > { %v3547_v11 = vpop.f32.mrf.mxu1  ;;  %v2879_v59 = vmul.f32 %v3697_v57, %v2725_v16 }
 0x7cb   : > { %v2970_v45 = vcombine.low %v2881_v29, %v2885_v15  ;;  %v2971_v60 = vcombine.high %v2881_v29, %v2885_v15 }
 0x7cd   : > { %v2978_v2 = vrot.slane %v2970_v45, %v4077_v33  ;;  %v2985_v25 = vrot.slane %v2971_v60, %v4077_v33 }
 0x7e8   : > { %v2816_v49 = vpop.f32.mrf.mxu0 }
 0x7e9   : > { %v2882_v44 = vmul.f32 %v3689_v6, %v2816_v49 }
 0x7ea   : > { %v3540_v10 = vpop.f32.mrf.mxu0 }
 0x7eb   : > { %v2886_v50 = vcombine.low %v2878_v23, %v2882_v44  ;;  %v2887_v27 = vcombine.high %v2878_v23, %v2882_v44 }
 0x7ec   : > { %v2819_v56 = vpop.f32.mrf.mxu0 }
 0x7ed   : > { %v2894_v43 = vrot.slane %v2886_v50, %v4077_v33  ;;  %v2901_v37 = vrot.slane %v2887_v27, %v4077_v33  ;;  %v2883_v58 = vmul.f32 %v3695_v54, %v2819_v56 }
 0x7ee   : > { %v3541_v52 = vpop.f32.mrf.mxu0 }
 0x7ef   : > { %v2918_v4 = vcombine.low %v2894_v43, %v2910_v55  ;;  %v2919_v28 = vcombine.high %v2894_v43, %v2910_v55  ;;  %v2934_v20 = vcombine.low %v2901_v37, %v2917_v13  ;;  %v2935_v63 = vcombine.high %v2901_v37, %v2917_v13 }
 0x7f0   : > { %v2954_v24 = vcombine.low %v2879_v59, %v2883_v58  ;;  %v2955_v26 = vcombine.high %v2879_v59, %v2883_v58 }
 0x7f1   : > { %v2926_v7 = vrot.slane %v2918_v4, %v4087_v53  ;;  %v2933_v0 = vrot.slane %v2919_v28, %v4087_v53  ;;  %v2942_v39 = vrot.slane %v2934_v20, %v4087_v53  ;;  %v2949_v9 = vrot.slane %v2935_v63, %v4087_v53 }
 0x7f2   : > { %v2962_v18 = vrot.slane %v2954_v24, %v4077_v33  ;;  %v2969_v31 = vrot.slane %v2955_v26, %v4077_v33 }
 0x7f3   : > { %v3022_v32 = vcombine.low %v2926_v7, %v2933_v0  ;;  %v3364_v34 = vcombine.high %v2926_v7, %v2933_v0  ;;  %v3038_v35 = vcombine.low %v2942_v39, %v2949_v9  ;;  %v3365_v12 = vcombine.high %v2942_v39, %v2949_v9 }
 0x7f4   : > { %v2986_v14 = vcombine.low %v2962_v18, %v2978_v2  ;;  %v2987_v47 = vcombine.high %v2962_v18, %v2978_v2  ;;  %v3002_v36 = vcombine.low %v2969_v31, %v2985_v25  ;;  %v3003_v16 = vcombine.high %v2969_v31, %v2985_v25 }
 0x7f5   : > { %v3029_v40 = vrot.slane %v3022_v32, %v4077_v33  ;;  %v3037_v21 = vrot.slane %v3364_v34, %v4077_v33  ;;  %v3045_v30 = vrot.slane %v3038_v35, %v4077_v33  ;;  %v3053_v41 = vrot.slane %v3365_v12, %v4077_v33 }
 0x7f6   : > { %v2994_v42 = vrot.slane %v2986_v14, %v4087_v53  ;;  %v3001_v3 = vrot.slane %v2987_v47, %v4087_v53  ;;  %v3010_v51 = vrot.slane %v3002_v36, %v4087_v53  ;;  %v3017_v5 = vrot.slane %v3003_v16, %v4087_v53 }
 0x7f7   : > { %v3055_v38 = vcombine.high %v3029_v40, %v3037_v21  ;;  %v3071_v11 = vcombine.high %v3045_v30, %v3053_v41  ;;  %v3054_v8 = vcombine.low %v3029_v40, %v3037_v21  ;;  %v3070_v61 = vcombine.low %v3045_v30, %v3053_v41 }
 0x7f8   : > { %v3090_v22 = vcombine.low %v2994_v42, %v3001_v3  ;;  %v3366_v1 = vcombine.high %v2994_v42, %v3001_v3  ;;  %v3106_v62 = vcombine.low %v3010_v51, %v3017_v5  ;;  %v3367_v6 = vcombine.high %v3010_v51, %v3017_v5 }
 0x7f9   : > { %v3069_v19 = vrot.slane %v3055_v38, %v4087_v53  ;;  %v3085_v49 = vrot.slane %v3071_v11, %v4087_v53  ;;  %v3062_v48 = vrot.slane %v3054_v8, %v4087_v53  ;;  %v3078_v23 = vrot.slane %v3070_v61, %v4087_v53 }
 0x7fa   : > { %v3097_v46 = vrot.slane %v3090_v22, %v4077_v33  ;;  %v3105_v44 = vrot.slane %v3366_v1, %v4077_v33  ;;  %v3113_v15 = vrot.slane %v3106_v62, %v4077_v33  ;;  %v3121_v10 = vrot.slane %v3367_v6, %v4077_v33 }
 0x7fb   : > { %v3088_v17 = vcombine.low %v3069_v19, %v3085_v49  ;;  %v3087_v50 = vcombine.high %v3062_v48, %v3078_v23  ;;  %v3086_v27 = vcombine.low %v3062_v48, %v3078_v23  ;;  %v3089_v43 = vcombine.high %v3069_v19, %v3085_v49 }
 0x7fc   : > { %v3122_v54 = vcombine.low %v3097_v46, %v3105_v44  ;;  %v3138_v29 = vcombine.low %v3113_v15, %v3121_v10  ;;  %v3123_v55 = vcombine.high %v3097_v46, %v3105_v44  ;;  %v3139_v56 = vcombine.high %v3113_v15, %v3121_v10 }
 0x7fd   : > { %3168 = vrot.lane.b32.xlu0 %v3088_v17, %s3861_s8  ;;  %3160 = vrot.lane.b32.xlu1 %v3087_v50, %s3860_s7 }
 0x7fe   : > { %v3130_v57 = vrot.slane %v3122_v54, %v4087_v53  ;;  %v3146_v13 = vrot.slane %v3138_v29, %v4087_v53  ;;  %v3137_v58 = vrot.slane %v3123_v55, %v4087_v53  ;;  %v3153_v33 = vrot.slane %v3139_v56, %v4087_v53 }
 0x800   : > { %v3155_v37 = vcombine.high %v3130_v57, %v3146_v13  ;;  %v3154_v59 = vcombine.low %v3130_v57, %v3146_v13  ;;  %v3156_v45 = vcombine.low %v3137_v58, %v3153_v33  ;;  %v3157_v60 = vcombine.high %v3137_v58, %v3153_v33 }
 0x801   : > { %3176 = vrot.lane.b32.xlu0 %v3089_v43, %s3862_s9 }
 0x802   : > { %3162 = vrot.lane.b32.xlu1 %v3155_v37, %s3860_s7 }
 0x806   : > { %3170 = vrot.lane.b32.xlu1 %v3156_v45, %s3861_s8 }
 0x80a   : > { %3178 = vrot.lane.b32.xlu1 %v3157_v60, %s3862_s9 }
 0x86f   : > { %v3169_v52 = vpop.permute.xlu0 %3168  ;;  %v3161_v4 = vpop.permute.xlu1 %3160 }
 0x870   : > { %v3182_v28 = vsel %vm1021_vm3, %v3086_v27, %v3161_v4 }
 0x871   : > { %v3184_v20 = vsel %vm403_vm2, %v3182_v28, %v3169_v52 }
 0x873   : > { %v3177_v53 = vpop.permute.xlu0 %3176 }
 0x874   : > { %v3186_v63 = vsel %vm1795_vm5, %v3184_v20, %v3177_v53  ;;  %v3163_v24 = vpop.permute.xlu1 %3162 }
 0x875   : > { %3368 = vst.msk [vmem:[%s4520_s24 + $0x10] sm:$0xff] %vm284_vm0, %v3186_v63  ;;  %v3183_v7 = vsel %vm1021_vm3, %v3154_v59, %v3163_v24 }
 0x878   : > { %v3171_v26 = vpop.permute.xlu1 %3170 }
 0x879   : > { %v3185_v0 = vsel %vm403_vm2, %v3183_v7, %v3171_v26 }
 0x87c   : > { %v3179_v39 = vpop.permute.xlu1 %3178 }
 0x87d   : > { %v3187_v9 = vsel %vm1795_vm5, %v3185_v0, %v3179_v39 }
 0x87e   : > { %3369 = vst.msk [vmem:[%s4520_s24 + $0x18] sm:$0xff] %vm284_vm0, %v3187_v9 }
 0x87f   : > { %3791 = shalt.err (!%p3788_p3)
}
 0x880   : > { %s3792_s5 = scalar_lea.hbm %s4584_s25, 512  ;;  %s3796_s9 = scalar_lea.hbm %s4635_s4, 1024 }
 0x881   : > { %p3793_p11 = scmp.ne.s32.totalorder %s4584_s25, %s3792_s5  ;;  %p3797_p4 = scmp.lt.s32.totalorder %s4584_s25, %s4635_s4 }
 0x882   : > { %p3798_p6 = scmp.lt.s32.totalorder %s3796_s9, %s3792_s5 }
 0x883   : > { %p3794_p9 = pnand %p3793_p11, %p4650_p2 }
 0x884   : > { %p3799_p8 = por %p3798_p6, %p3797_p4 }
 0x885   : > { %p3795_p1 = pneg %p3794_p9 }
 0x887   : > { %p3800_p5 = pnand %p3799_p8, %p3795_p1 }
 0x889   : > { %3803 = shalt.err (!%p3800_p5)
}
 0x88a   : > { %s3864_s6 = smov 128  }
 0x88b   : > { %3558 = dma.vmem_to_hbm [thread:$0]  (%p4650_p2), %s4577_s28, 512, %s4584_s25, %s3192_s19, %s3864_s6, %s3864_s6, %s3860_s7  }
 0x88c PF: > { %s3221_s12 = sand.u32 1, %s3834_s15   ;;  %p4651_p7 = scmp.ne.s32.totalorder %s4641_s22, 0 }
 0x88d   : > { %p4652_p12 = scmp.ge.s32.totalorder %s3846_s18, 2  ;;  %s3222_s13 = scalar_lea.sflag [#allocation4], %s3221_s12 }
 0x88f   : > { %p3572_p13 = pnand %p4652_p12, %p4651_p7 }
 0x891   : > { %p3573_p0 = pneg %p3572_p13 }
 0x893   : > { %3829 = dma.done.wait (%p3573_p0), %s3222_s13, 512  }
 0x894   : > { %3831 = vsyncadd (%p3573_p0), %s3222_s13, 4294966784  ;;  %p18_p10 = scmp.ge.s32.totalorder %s3968_s11, 4   ;;  %s4653_s15 = smov %s3838_s16 }
 0x895   : > { %s4654_s16 = smov %s3842_s17  ;;  %s4655_s17 = smov %s3984_s20 }
 0x896   : > { %s4656_s18 = smov %s3968_s11  ;;  %20 = sbr.rel (!%p18_p10) target bundleno = 6 (0x6), region = 90 }
 0x89b   :  { %3227 = vsyncpa [#allocation3], 1 }
 0x89c   :  { %3229 = vsyncpa [#allocation3 + $0x1], 1 }
 0x89d   :  { %3230 = vsyncpa [#allocation6], 1 }
 0x89e   :  { %3231 = vsyncpa [#allocation4], 1 }
 0x89f   :  { %3233 = vsyncpa [#allocation4 + $0x1], 1 }

</bundles_post_ra>
